<compile_context>
chip_gen: v7x
topology: tpu7x:2x2x1
jax: 0.10.0
libtpu: 0.0.40
codegen_flags: <defaults>
</compile_context>

<pallas_src>
import functools

import jax
import jax.numpy as jnp
from jax.experimental import pallas as pl
from jax.experimental.pallas import tpu as pltpu


def _round_up(x, m):
  return ((x + m - 1) // m) * m


def _recurrent_kernel(
    att1_ref, feat_ref, c0_ref, gates_emb_ref,
    w_dec_t_ref, v_full_ref, score_bias_ref,
    w_ih_ctx_ref, w_hh_ref,
    h_seq_ref, alpha_ref, h_out_ref, c_out_ref,
    h_sc, c_sc,
    *, hidden_size):
  """One grid step == one decoding timestep; (h, c) carried in VMEM scratch."""
  H = hidden_size
  t = pl.program_id(0)

  @pl.when(t == 0)
  def _init():
    h_sc[...] = jnp.zeros_like(h_sc)
    c_sc[...] = c0_ref[...]

  h = h_sc[...]                                   # (B, H)
  c = c_sc[...]                                   # (B, H)

  att1 = att1_ref[...]                            # (B, A, Pp)  pixel-last, +b_dec folded
  feats = feat_ref[...]                           # (B, E, Pp)  pixel-last, zero-padded
  w_dec_t = w_dec_t_ref[...]                      # (A, H)
  v_full = v_full_ref[...]                        # (A, Pp)  full_att weight lane-broadcast
  score_bias = score_bias_ref[...]                # (1, Pp)  b_att on valid, -1e30 on pads

  # --- AdditiveAttention(features, h) ---
  # att2 via elementwise mul + lane-reduce (keepdims) so the pixel broadcast
  # below is a pure lane broadcast.
  att2 = jnp.sum(h[:, None, :] * w_dec_t[None, :, :],
                 axis=-1, keepdims=True)                         # (B, A, 1)
  e = jnp.maximum(att1 + att2, 0.0)                              # (B, A, Pp)
  scores = jnp.sum(e * v_full[None, :, :], axis=1) + score_bias  # (B, Pp)
  scores = scores - jnp.max(scores, axis=-1, keepdims=True)
  ex = jnp.exp(scores)
  alphas = ex * pl.reciprocal(jnp.sum(ex, axis=-1, keepdims=True),
                              approx=True)                       # softmax over pixels
  context = jnp.sum(feats * alphas[:, None, :], axis=-1)         # (B, E)

  # --- LSTMCell([embedding_t, context], (h, c)) ---
  # Embedding-path contribution (emb_t @ W_ih_emb + b_ih + b_hh) is precomputed
  # in the wrapper and streamed in per step.
  gates = (gates_emb_ref[0]
           + jnp.dot(context, w_ih_ctx_ref[...],
                     preferred_element_type=jnp.float32)
           + jnp.dot(h, w_hh_ref[...],
                     preferred_element_type=jnp.float32))        # (B, 4H) i,f,g,o
  i_g = jax.nn.sigmoid(gates[:, 0:H])
  f_g = jax.nn.sigmoid(gates[:, H:2 * H])
  g_g = jnp.tanh(gates[:, 2 * H:3 * H])
  o_g = jax.nn.sigmoid(gates[:, 3 * H:4 * H])
  c_new = f_g * c + i_g * g_g
  h_new = o_g * jnp.tanh(c_new)

  h_sc[...] = h_new
  c_sc[...] = c_new
  h_seq_ref[0] = h_new                                           # streamed over T
  alpha_ref[0] = alphas                                          # streamed over T
  h_out_ref[...] = h_new                                         # final state (resident)
  c_out_ref[...] = c_new


def _vocab_projection_kernel(h_ref, w_ref, b_ref, o_ref):
  """(T*B, H) @ (H, tn) + bias — one V-tile per grid step."""
  o_ref[...] = (jnp.dot(h_ref[...], w_ref[...],
                        preferred_element_type=jnp.float32) + b_ref[...])


def decoder_forward(features, captions, params):
  """Pallas equivalent of DecoderWithAttention.forward.

  Returns (predictions (B,T,V), (h, c), alphas (B,T,P))."""
  B, P, E = features.shape
  T = captions.shape[1]
  emb_table = params['embedding']
  embed = emb_table.shape[1]
  H = params['w_hh'].shape[0]
  A = params['w_dec'].shape[1]
  V = params['w_out'].shape[1]

  LANE = 128
  Pp = _round_up(P, LANE)          # lane-dense pixel / softmax axis
  Vp = _round_up(V, LANE)          # lane-dense vocab axis
  f32 = jnp.float32

  # ---------------- time-invariant work hoisted out of the recurrence --------
  # Embedding gather + embedding gate path (one big matmul, biases folded in).
  cap_emb = jnp.take(emb_table, captions, axis=0).astype(f32)             # (B,T,embed)
  gates_emb = (jnp.einsum('bte,eg->btg', cap_emb, params['w_ih'][:embed])
               + params['b_ih'] + params['b_hh'])                         # (B,T,4H)
  gates_emb = jnp.transpose(gates_emb, (1, 0, 2)).astype(f32)             # (T,B,4H)

  # Initial cell state c0 = linear_features(features.view(B, -1)).
  c0 = (features.reshape(B, P * E) @ params['w_lf'] + params['b_lf']).astype(f32)

  # Encoder-side attention projection, pixel-last layout, b_dec folded in.
  att1_bpa = (jnp.einsum('bpe,ea->bpa', features, params['w_enc'])
              + (params['b_enc'] + params['b_dec'])[None, :, :])          # (B,P,A)
  att1 = jnp.zeros((B, A, Pp), f32).at[:, :, :P].set(
      jnp.transpose(att1_bpa, (0, 2, 1)))                                 # (B,A,Pp)
  feats = jnp.zeros((B, E, Pp), f32).at[:, :, :P].set(
      jnp.transpose(features, (0, 2, 1)).astype(f32))                     # (B,E,Pp)
  v_full = jnp.broadcast_to(params['v_att'].reshape(A, 1), (A, Pp)).astype(f32)
  score_bias = jnp.full((1, Pp), -1e30, f32).at[:, :P].set(
      params['b_att'][0, 0])                                              # mask + b_att

  w_dec_t = jnp.transpose(params['w_dec']).astype(f32)                    # (A, H)
  w_ih_ctx = params['w_ih'][embed:].astype(f32)                           # (E, 4H)
  w_hh = params['w_hh'].astype(f32)                                       # (H, 4H)

  # ---------------- recurrence kernel: grid over timesteps -------------------
  rec_kernel = functools.partial(_recurrent_kernel, hidden_size=H)

  def const_spec(shape):
    nd = len(shape)
    return pl.BlockSpec(shape, lambda t, _nd=nd: (0,) * _nd)

  in_specs = [
      const_spec((B, A, Pp)),                                   # att1
      const_spec((B, E, Pp)),                                   # feats
      const_spec((B, H)),                                       # c0
      pl.BlockSpec((1, B, 4 * H), lambda t: (t, 0, 0)),         # gates_emb (streamed)
      const_spec((A, H)),                                       # w_dec_t
      const_spec((A, Pp)),                                      # v_full
      const_spec((1, Pp)),                                      # score_bias
      const_spec((E, 4 * H)),                                   # w_ih_ctx
      const_spec((H, 4 * H)),                                   # w_hh
  ]
  out_specs = [
      pl.BlockSpec((1, B, H), lambda t: (t, 0, 0)),             # h_seq (streamed)
      pl.BlockSpec((1, B, Pp), lambda t: (t, 0, 0)),            # alphas (streamed)
      const_spec((B, H)),                                       # h_final
      const_spec((B, H)),                                       # c_final
  ]
  out_shape = [
      jax.ShapeDtypeStruct((T, B, H), f32),
      jax.ShapeDtypeStruct((T, B, Pp), f32),
      jax.ShapeDtypeStruct((B, H), f32),
      jax.ShapeDtypeStruct((B, H), f32),
  ]

  h_seq, alphas_tm, h_fin, c_fin = pl.pallas_call(
      rec_kernel,
      out_shape=out_shape,
      grid_spec=pltpu.PrefetchScalarGridSpec(
          num_scalar_prefetch=0,
          grid=(T,),
          in_specs=in_specs,
          out_specs=out_specs,
          scratch_shapes=[pltpu.VMEM((B, H), f32),              # h carry
                          pltpu.VMEM((B, H), f32)]),            # c carry
      compiler_params=pltpu.CompilerParams(
          dimension_semantics=("arbitrary",)),
  )(att1, feats, c0, gates_emb, w_dec_t, v_full, score_bias, w_ih_ctx, w_hh)

  # ---------------- vocab projection: one big matmul, tiled over V -----------
  w_out_p = jnp.zeros((H, Vp), f32).at[:, :V].set(params['w_out'])
  b_out_p = jnp.zeros((1, Vp), f32).at[:, :V].set(params['b_out'])
  TB = T * B
  TN = 128
  h_flat = h_seq.reshape(TB, H)

  preds_flat = pl.pallas_call(
      _vocab_projection_kernel,
      out_shape=jax.ShapeDtypeStruct((TB, Vp), f32),
      grid_spec=pltpu.PrefetchScalarGridSpec(
          num_scalar_prefetch=0,
          grid=(Vp // TN,),
          in_specs=[pl.BlockSpec((TB, H), lambda j: (0, 0)),
                    pl.BlockSpec((H, TN), lambda j: (0, j)),
                    pl.BlockSpec((1, TN), lambda j: (0, j))],
          out_specs=pl.BlockSpec((TB, TN), lambda j: (0, j))),
      compiler_params=pltpu.CompilerParams(
          dimension_semantics=("parallel",)),
  )(h_flat, w_out_p, b_out_p)

  predictions = jnp.transpose(
      preds_flat.reshape(T, B, Vp)[:, :, :V], (1, 0, 2))        # (B, T, V)
  alphas = jnp.transpose(alphas_tm[:, :, :P], (1, 0, 2))        # (B, T, P)
  return predictions, (h_fin, c_fin), alphas


def decoder_forward_ref(features, captions, params):
  """Pure-JAX reference (mirrors the PyTorch forward). Also returns alphas."""
  B, P, E = features.shape
  T = captions.shape[1]
  H = params['w_hh'].shape[0]
  cap_emb = jnp.take(params['embedding'], captions, axis=0)
  c = features.reshape(B, -1) @ params['w_lf'] + params['b_lf'][0]
  h = jnp.zeros_like(c)
  att1 = jnp.einsum('bpe,ea->bpa', features, params['w_enc']) + params['b_enc'][0]
  preds, alphas_all = [], []
  for i in range(T):
    att2 = h @ params['w_dec'] + params['b_dec'][0]
    e = jnp.maximum(att1 + att2[:, None, :], 0.0)
    scores = (jnp.sum(e * params['v_att'][0][None, None, :], axis=-1)
              + params['b_att'][0, 0])
    alphas = jax.nn.softmax(scores, axis=1)
    context = jnp.einsum('bp,bpe->be', alphas, features)
    x = jnp.concatenate([cap_emb[:, i], context], axis=1)
    gates = (x @ params['w_ih'] + params['b_ih'][0]
             + h @ params['w_hh'] + params['b_hh'][0])
    i_g = jax.nn.sigmoid(gates[:, :H])
    f_g = jax.nn.sigmoid(gates[:, H:2 * H])
    g_g = jnp.tanh(gates[:, 2 * H:3 * H])
    o_g = jax.nn.sigmoid(gates[:, 3 * H:])
    c = f_g * c + i_g * g_g
    h = o_g * jnp.tanh(c)
    preds.append(h @ params['w_out'] + params['b_out'][0])
    alphas_all.append(alphas)
  return jnp.stack(preds, axis=1), (h, c), jnp.stack(alphas_all, axis=1)


if __name__ == "__main__":
  # small shapes consistent with the module; B chosen sublane-dense (8)
  B, P, E = 8, 8, 16           # batch, num_pixels, encoder_size
  embed, H, A = 16, 32, 16     # embed_size, hidden_size, attention_size
  V, T = 32, 6                 # vocab_size, max_seq_length

  key = jax.random.PRNGKey(0)
  ks = jax.random.split(key, 18)

  def init(k, shape, scale=0.1):
    return (scale * jax.random.normal(k, shape)).astype(jnp.float32)

  # deterministic synthetic parameters (PyTorch Linear weights stored pre-transposed)
  params = {
      'w_lf':  init(ks[0],  (P * E, H)),          # linear_features
      'b_lf':  init(ks[1],  (1, H)),
      'w_enc': init(ks[2],  (E, A)),              # attention.encoder_att
      'b_enc': init(ks[3],  (1, A)),
      'w_dec': init(ks[4],  (H, A)),              # attention.decoder_att
      'b_dec': init(ks[5],  (1, A)),
      'v_att': init(ks[6],  (1, A)),              # attention.full_att weight
      'b_att': init(ks[7],  (1, 1)),              # attention.full_att bias
      'embedding': init(ks[8], (V, embed), scale=0.5),
      'w_ih':  init(ks[9],  (embed + E, 4 * H)),  # LSTMCell (gate order i,f,g,o)
      'b_ih':  init(ks[10], (1, 4 * H)),
      'w_hh':  init(ks[11], (H, 4 * H)),
      'b_hh':  init(ks[12], (1, 4 * H)),
      'w_out': init(ks[13], (H, V)),              # final vocab projection
      'b_out': init(ks[14], (1, V)),
  }

  features = init(ks[15], (B, P, E), scale=1.0)
  captions = jax.random.randint(ks[16], (B, T), 0, V, dtype=jnp.int32)
  lengths = jnp.full((B,), T, dtype=jnp.int32)  # unused by forward compute (as in PyTorch code)

  preds, (h, c), alphas = decoder_forward(features, captions, params)
  jax.block_until_ready((preds, h, c, alphas))

  preds_ref, (h_ref, c_ref), alphas_ref = decoder_forward_ref(features, captions, params)
  assert jnp.allclose(preds, preds_ref, atol=2e-2, rtol=2e-2)
  assert jnp.allclose(h, h_ref, atol=2e-2, rtol=2e-2)
  assert jnp.allclose(c, c_ref, atol=2e-2, rtol=2e-2)
  assert jnp.allclose(alphas, alphas_ref, atol=2e-2, rtol=2e-2)

  print("KERNEL_OK")
</pallas_src>

<mosaic_0001>
module attributes {stable_mosaic.version = 11 : i64} {
  func.func @_recurrent_kernel(%arg0: i32, %arg1: memref<8x16x128xf32, #tpu.memory_space<vmem>>, %arg2: memref<8x16x128xf32, #tpu.memory_space<vmem>>, %arg3: memref<8x32xf32, #tpu.memory_space<vmem>>, %arg4: memref<1x8x128xf32, #tpu.memory_space<vmem>>, %arg5: memref<16x32xf32, #tpu.memory_space<vmem>>, %arg6: memref<16x128xf32, #tpu.memory_space<vmem>>, %arg7: memref<1x128xf32, #tpu.memory_space<vmem>>, %arg8: memref<16x128xf32, #tpu.memory_space<vmem>>, %arg9: memref<32x128xf32, #tpu.memory_space<vmem>>, %arg10: memref<1x8x32xf32, #tpu.memory_space<vmem>>, %arg11: memref<1x8x128xf32, #tpu.memory_space<vmem>>, %arg12: memref<8x32xf32, #tpu.memory_space<vmem>>, %arg13: memref<8x32xf32, #tpu.memory_space<vmem>>, %arg14: memref<8x32xf32, #tpu.memory_space<vmem>>, %arg15: memref<8x32xf32, #tpu.memory_space<vmem>>) attributes {dimension_semantics = [#tpu.dimension_semantics<arbitrary>], iteration_bounds = array<i64: 6>, scalar_prefetch = 0 : i64, scratch_operands = 2 : i64, tpu.core_type = #tpu.core_type<tc>, window_params = [{pipeline_mode = #tpu.pipeline_mode<synchronous>, transform_indices = @transform_0, window_bounds = array<i64: 8, 16, 128>}, {pipeline_mode = #tpu.pipeline_mode<synchronous>, transform_indices = @transform_1, window_bounds = array<i64: 8, 16, 128>}, {pipeline_mode = #tpu.pipeline_mode<synchronous>, transform_indices = @transform_2, window_bounds = array<i64: 8, 32>}, {transform_indices = @transform_3, window_bounds = array<i64: 1, 8, 128>}, {pipeline_mode = #tpu.pipeline_mode<synchronous>, transform_indices = @transform_4, window_bounds = array<i64: 16, 32>}, {pipeline_mode = #tpu.pipeline_mode<synchronous>, transform_indices = @transform_5, window_bounds = array<i64: 16, 128>}, {pipeline_mode = #tpu.pipeline_mode<synchronous>, transform_indices = @transform_6, window_bounds = array<i64: 1, 128>}, {pipeline_mode = #tpu.pipeline_mode<synchronous>, transform_indices = @transform_7, window_bounds = array<i64: 16, 128>}, {pipeline_mode = #tpu.pipeline_mode<synchronous>, transform_indices = @transform_8, window_bounds = array<i64: 32, 128>}, {transform_indices = @transform_9, window_bounds = array<i64: 1, 8, 32>}, {transform_indices = @transform_10, window_bounds = array<i64: 1, 8, 128>}, {pipeline_mode = #tpu.pipeline_mode<synchronous>, transform_indices = @transform_11, window_bounds = array<i64: 8, 32>}, {pipeline_mode = #tpu.pipeline_mode<synchronous>, transform_indices = @transform_12, window_bounds = array<i64: 8, 32>}]} {
    %c0_i32 = arith.constant 0 : i32
    %0 = arith.cmpi eq, %arg0, %c0_i32 : i32
    %1 = arith.extui %0 : i1 to i32
    %c0_i32_0 = arith.constant 0 : i32
    %2 = arith.cmpi ne, %1, %c0_i32_0 : i32
    scf.if %2 {
      %cst_47 = arith.constant 0.000000e+00 : f32
      %84 = vector.broadcast %cst_47 : f32 to vector<8x32xf32>
      %c0_48 = arith.constant 0 : index
      %c0_49 = arith.constant 0 : index
      %85 = vector.load %arg14[%c0_48, %c0_49] : memref<8x32xf32, #tpu.memory_space<vmem>>, vector<8x32xf32>
      tpu.vector_store %arg14[%c0_48, %c0_49], %84 {strides = array<i32>} : memref<8x32xf32, #tpu.memory_space<vmem>>, vector<8x32xf32>,
      %c0_50 = arith.constant 0 : index
      %c0_51 = arith.constant 0 : index
      %86 = vector.load %arg3[%c0_50, %c0_51] : memref<8x32xf32, #tpu.memory_space<vmem>>, vector<8x32xf32>
      %c0_52 = arith.constant 0 : index
      %c0_53 = arith.constant 0 : index
      %87 = vector.load %arg15[%c0_52, %c0_53] : memref<8x32xf32, #tpu.memory_space<vmem>>, vector<8x32xf32>
      tpu.vector_store %arg15[%c0_52, %c0_53], %86 {strides = array<i32>} : memref<8x32xf32, #tpu.memory_space<vmem>>, vector<8x32xf32>,
    } else {
    }
    %c0 = arith.constant 0 : index
    %c0_1 = arith.constant 0 : index
    %3 = vector.load %arg14[%c0, %c0_1] : memref<8x32xf32, #tpu.memory_space<vmem>>, vector<8x32xf32>
    %c0_2 = arith.constant 0 : index
    %c0_3 = arith.constant 0 : index
    %4 = vector.load %arg15[%c0_2, %c0_3] : memref<8x32xf32, #tpu.memory_space<vmem>>, vector<8x32xf32>
    %c0_4 = arith.constant 0 : index
    %c0_5 = arith.constant 0 : index
    %c0_6 = arith.constant 0 : index
    %5 = vector.load %arg1[%c0_4, %c0_5, %c0_6] : memref<8x16x128xf32, #tpu.memory_space<vmem>>, vector<8x16x128xf32>
    %c0_7 = arith.constant 0 : index
    %c0_8 = arith.constant 0 : index
    %c0_9 = arith.constant 0 : index
    %6 = vector.load %arg2[%c0_7, %c0_8, %c0_9] : memref<8x16x128xf32, #tpu.memory_space<vmem>>, vector<8x16x128xf32>
    %c0_10 = arith.constant 0 : index
    %c0_11 = arith.constant 0 : index
    %7 = vector.load %arg5[%c0_10, %c0_11] : memref<16x32xf32, #tpu.memory_space<vmem>>, vector<16x32xf32>
    %c0_12 = arith.constant 0 : index
    %c0_13 = arith.constant 0 : index
    %8 = vector.load %arg6[%c0_12, %c0_13] : memref<16x128xf32, #tpu.memory_space<vmem>>, vector<16x128xf32>
    %c0_14 = arith.constant 0 : index
    %c0_15 = arith.constant 0 : index
    %9 = vector.load %arg7[%c0_14, %c0_15] : memref<1x128xf32, #tpu.memory_space<vmem>>, vector<1x128xf32>
    %10 = vector.shape_cast %3 : vector<8x32xf32> to vector<8x1x32xf32>
    %11 = vector.shape_cast %7 : vector<16x32xf32> to vector<1x16x32xf32>
    %12 = vector.broadcast %10 : vector<8x1x32xf32> to vector<8x16x32xf32>
    %13 = vector.broadcast %11 : vector<1x16x32xf32> to vector<8x16x32xf32>
    %14 = arith.mulf %12, %13 : vector<8x16x32xf32>
    %cst = arith.constant dense<0.000000e+00> : vector<8x16xf32>
    %15 = vector.multi_reduction <add>, %14, %cst [2] : vector<8x16x32xf32> to vector<8x16xf32>
    %16 = vector.shape_cast %15 : vector<8x16xf32> to vector<8x16x1xf32>
    %17 = vector.broadcast %16 : vector<8x16x1xf32> to vector<8x16x128xf32>
    %18 = arith.addf %5, %17 : vector<8x16x128xf32>
    %cst_16 = arith.constant 0.000000e+00 : f32
    %19 = vector.broadcast %cst_16 : f32 to vector<8x16x128xf32>
    %20 = arith.maximumf %18, %19 : vector<8x16x128xf32>
    %21 = vector.shape_cast %8 : vector<16x128xf32> to vector<1x16x128xf32>
    %22 = vector.broadcast %21 : vector<1x16x128xf32> to vector<8x16x128xf32>
    %23 = arith.mulf %20, %22 : vector<8x16x128xf32>
    %cst_17 = arith.constant dense<0.000000e+00> : vector<8x128xf32>
    %24 = vector.multi_reduction <add>, %23, %cst_17 [1] : vector<8x16x128xf32> to vector<8x128xf32>
    %25 = vector.broadcast %9 : vector<1x128xf32> to vector<8x128xf32>
    %26 = arith.addf %24, %25 : vector<8x128xf32>
    %cst_18 = arith.constant dense<0xFF800000> : vector<8xf32>
    %27 = vector.multi_reduction <maximumf>, %26, %cst_18 [1] : vector<8x128xf32> to vector<8xf32>
    %28 = vector.shape_cast %27 : vector<8xf32> to vector<8x1xf32>
    %29 = vector.broadcast %28 : vector<8x1xf32> to vector<8x128xf32>
    %30 = arith.subf %26, %29 : vector<8x128xf32>
    %31 = math.exp %30 : vector<8x128xf32>
    %cst_19 = arith.constant dense<0.000000e+00> : vector<8xf32>
    %32 = vector.multi_reduction <add>, %31, %cst_19 [1] : vector<8x128xf32> to vector<8xf32>
    %33 = vector.shape_cast %32 : vector<8xf32> to vector<8x1xf32>
    %34 = tpu.reciprocal %33 {approx = true} : vector<8x1xf32> -> vector<8x1xf32>
    %35 = vector.broadcast %34 : vector<8x1xf32> to vector<8x128xf32>
    %36 = arith.mulf %31, %35 : vector<8x128xf32>
    %37 = vector.shape_cast %36 : vector<8x128xf32> to vector<8x1x128xf32>
    %38 = vector.broadcast %37 : vector<8x1x128xf32> to vector<8x16x128xf32>
    %39 = arith.mulf %6, %38 : vector<8x16x128xf32>
    %cst_20 = arith.constant dense<0.000000e+00> : vector<8x16xf32>
    %40 = vector.multi_reduction <add>, %39, %cst_20 [2] : vector<8x16x128xf32> to vector<8x16xf32>
    %c0_21 = arith.constant 0 : index
    %c0_22 = arith.constant 0 : index
    %c0_23 = arith.constant 0 : index
    %41 = vector.load %arg4[%c0_21, %c0_22, %c0_23] : memref<1x8x128xf32, #tpu.memory_space<vmem>>, vector<1x8x128xf32>
    %42 = vector.shape_cast %41 : vector<1x8x128xf32> to vector<8x128xf32>
    %c0_24 = arith.constant 0 : index
    %c0_25 = arith.constant 0 : index
    %43 = vector.load %arg8[%c0_24, %c0_25] : memref<16x128xf32, #tpu.memory_space<vmem>>, vector<16x128xf32>
    %cst_26 = arith.constant dense<0.000000e+00> : vector<8x128xf32>
    %44 = tpu.matmul %40, %43, %cst_26 {dimension_numbers = #tpu.dot_dimension_numbers<[1], [0], [0], [1], [0, 0, 1, 1], [], []>} : vector<8x16xf32>, vector<16x128xf32>, vector<8x128xf32> -> vector<8x128xf32>
    %45 = arith.addf %42, %44 : vector<8x128xf32>
    %c0_27 = arith.constant 0 : index
    %c0_28 = arith.constant 0 : index
    %46 = vector.load %arg9[%c0_27, %c0_28] : memref<32x128xf32, #tpu.memory_space<vmem>>, vector<32x128xf32>
    %cst_29 = arith.constant dense<0.000000e+00> : vector<8x128xf32>
    %47 = tpu.matmul %3, %46, %cst_29 {dimension_numbers = #tpu.dot_dimension_numbers<[1], [0], [0], [1], [0, 0, 1, 1], [], []>} : vector<8x32xf32>, vector<32x128xf32>, vector<8x128xf32> -> vector<8x128xf32>
    %48 = arith.addf %45, %47 : vector<8x128xf32>
    %49 = vector.extract_strided_slice %48 {offsets = [0, 0], sizes = [8, 32], strides = [1, 1]} : vector<8x128xf32> to vector<8x32xf32>
    %50 = arith.negf %49 : vector<8x32xf32>
    %51 = math.exp %50 : vector<8x32xf32>
    %cst_30 = arith.constant 1.000000e+00 : f32
    %52 = vector.broadcast %cst_30 : f32 to vector<8x32xf32>
    %53 = arith.addf %52, %51 : vector<8x32xf32>
    %54 = arith.divf %52, %53 : vector<8x32xf32>
    %55 = vector.extract_strided_slice %48 {offsets = [0, 32], sizes = [8, 32], strides = [1, 1]} : vector<8x128xf32> to vector<8x32xf32>
    %56 = arith.negf %55 : vector<8x32xf32>
    %57 = math.exp %56 : vector<8x32xf32>
    %cst_31 = arith.constant 1.000000e+00 : f32
    %58 = vector.broadcast %cst_31 : f32 to vector<8x32xf32>
    %59 = arith.addf %58, %57 : vector<8x32xf32>
    %60 = arith.divf %58, %59 : vector<8x32xf32>
    %61 = vector.extract_strided_slice %48 {offsets = [0, 64], sizes = [8, 32], strides = [1, 1]} : vector<8x128xf32> to vector<8x32xf32>
    %62 = math.tanh %61 : vector<8x32xf32>
    %63 = vector.extract_strided_slice %48 {offsets = [0, 96], sizes = [8, 32], strides = [1, 1]} : vector<8x128xf32> to vector<8x32xf32>
    %64 = arith.negf %63 : vector<8x32xf32>
    %65 = math.exp %64 : vector<8x32xf32>
    %cst_32 = arith.constant 1.000000e+00 : f32
    %66 = vector.broadcast %cst_32 : f32 to vector<8x32xf32>
    %67 = arith.addf %66, %65 : vector<8x32xf32>
    %68 = arith.divf %66, %67 : vector<8x32xf32>
    %69 = arith.mulf %60, %4 : vector<8x32xf32>
    %70 = arith.mulf %54, %62 : vector<8x32xf32>
    %71 = arith.addf %69, %70 : vector<8x32xf32>
    %72 = math.tanh %71 : vector<8x32xf32>
    %73 = arith.mulf %68, %72 : vector<8x32xf32>
    %c0_33 = arith.constant 0 : index
    %c0_34 = arith.constant 0 : index
    %74 = vector.load %arg14[%c0_33, %c0_34] : memref<8x32xf32, #tpu.memory_space<vmem>>, vector<8x32xf32>
    tpu.vector_store %arg14[%c0_33, %c0_34], %73 {strides = array<i32>} : memref<8x32xf32, #tpu.memory_space<vmem>>, vector<8x32xf32>,
    %c0_35 = arith.constant 0 : index
    %c0_36 = arith.constant 0 : index
    %75 = vector.load %arg15[%c0_35, %c0_36] : memref<8x32xf32, #tpu.memory_space<vmem>>, vector<8x32xf32>
    tpu.vector_store %arg15[%c0_35, %c0_36], %71 {strides = array<i32>} : memref<8x32xf32, #tpu.memory_space<vmem>>, vector<8x32xf32>,
    %c0_37 = arith.constant 0 : index
    %c0_38 = arith.constant 0 : index
    %c0_39 = arith.constant 0 : index
    %76 = vector.load %arg10[%c0_37, %c0_38, %c0_39] : memref<1x8x32xf32, #tpu.memory_space<vmem>>, vector<1x8x32xf32>
    %77 = vector.shape_cast %76 : vector<1x8x32xf32> to vector<8x32xf32>
    %78 = vector.shape_cast %73 : vector<8x32xf32> to vector<1x8x32xf32>
    tpu.vector_store %arg10[%c0_37, %c0_38, %c0_39], %78 {strides = array<i32>} : memref<1x8x32xf32, #tpu.memory_space<vmem>>, vector<1x8x32xf32>,
    %c0_40 = arith.constant 0 : index
    %c0_41 = arith.constant 0 : index
    %c0_42 = arith.constant 0 : index
    %79 = vector.load %arg11[%c0_40, %c0_41, %c0_42] : memref<1x8x128xf32, #tpu.memory_space<vmem>>, vector<1x8x128xf32>
    %80 = vector.shape_cast %79 : vector<1x8x128xf32> to vector<8x128xf32>
    %81 = vector.shape_cast %36 : vector<8x128xf32> to vector<1x8x128xf32>
    tpu.vector_store %arg11[%c0_40, %c0_41, %c0_42], %81 {strides = array<i32>} : memref<1x8x128xf32, #tpu.memory_space<vmem>>, vector<1x8x128xf32>,
    %c0_43 = arith.constant 0 : index
    %c0_44 = arith.constant 0 : index
    %82 = vector.load %arg12[%c0_43, %c0_44] : memref<8x32xf32, #tpu.memory_space<vmem>>, vector<8x32xf32>
    tpu.vector_store %arg12[%c0_43, %c0_44], %73 {strides = array<i32>} : memref<8x32xf32, #tpu.memory_space<vmem>>, vector<8x32xf32>,
    %c0_45 = arith.constant 0 : index
    %c0_46 = arith.constant 0 : index
    %83 = vector.load %arg13[%c0_45, %c0_46] : memref<8x32xf32, #tpu.memory_space<vmem>>, vector<8x32xf32>
    tpu.vector_store %arg13[%c0_45, %c0_46], %71 {strides = array<i32>} : memref<8x32xf32, #tpu.memory_space<vmem>>, vector<8x32xf32>,
    return
  }
  func.func @transform_0(%arg0: i32) -> (i32, i32, i32) {
    %c0_i32 = arith.constant 0 : i32
    %c0_i32_0 = arith.constant 0 : i32
    %c0_i32_1 = arith.constant 0 : i32
    %c0_i32_2 = arith.constant 0 : i32
    return %c0_i32, %c0_i32_0, %c0_i32_1 : i32, i32, i32
  }
  func.func @transform_1(%arg0: i32) -> (i32, i32, i32) {
    %c0_i32 = arith.constant 0 : i32
    %c0_i32_0 = arith.constant 0 : i32
    %c0_i32_1 = arith.constant 0 : i32
    %c0_i32_2 = arith.constant 0 : i32
    return %c0_i32, %c0_i32_0, %c0_i32_1 : i32, i32, i32
  }
  func.func @transform_2(%arg0: i32) -> (i32, i32) {
    %c0_i32 = arith.constant 0 : i32
    %c0_i32_0 = arith.constant 0 : i32
    %c0_i32_1 = arith.constant 0 : i32
    return %c0_i32, %c0_i32_0 : i32, i32
  }
  func.func @transform_3(%arg0: i32) -> (i32, i32, i32) {
    %c0_i32 = arith.constant 0 : i32
    %c0_i32_0 = arith.constant 0 : i32
    %c0_i32_1 = arith.constant 0 : i32
    return %arg0, %c0_i32, %c0_i32_0 : i32, i32, i32
  }
  func.func @transform_4(%arg0: i32) -> (i32, i32) {
    %c0_i32 = arith.constant 0 : i32
    %c0_i32_0 = arith.constant 0 : i32
    %c0_i32_1 = arith.constant 0 : i32
    return %c0_i32, %c0_i32_0 : i32, i32
  }
  func.func @transform_5(%arg0: i32) -> (i32, i32) {
    %c0_i32 = arith.constant 0 : i32
    %c0_i32_0 = arith.constant 0 : i32
    %c0_i32_1 = arith.constant 0 : i32
    return %c0_i32, %c0_i32_0 : i32, i32
  }
  func.func @transform_6(%arg0: i32) -> (i32, i32) {
    %c0_i32 = arith.constant 0 : i32
    %c0_i32_0 = arith.constant 0 : i32
    %c0_i32_1 = arith.constant 0 : i32
    return %c0_i32, %c0_i32_0 : i32, i32
  }
  func.func @transform_7(%arg0: i32) -> (i32, i32) {
    %c0_i32 = arith.constant 0 : i32
    %c0_i32_0 = arith.constant 0 : i32
    %c0_i32_1 = arith.constant 0 : i32
    return %c0_i32, %c0_i32_0 : i32, i32
  }
  func.func @transform_8(%arg0: i32) -> (i32, i32) {
    %c0_i32 = arith.constant 0 : i32
    %c0_i32_0 = arith.constant 0 : i32
    %c0_i32_1 = arith.constant 0 : i32
    return %c0_i32, %c0_i32_0 : i32, i32
  }
  func.func @transform_9(%arg0: i32) -> (i32, i32, i32) {
    %c0_i32 = arith.constant 0 : i32
    %c0_i32_0 = arith.constant 0 : i32
    %c0_i32_1 = arith.constant 0 : i32
    return %arg0, %c0_i32, %c0_i32_0 : i32, i32, i32
  }
  func.func @transform_10(%arg0: i32) -> (i32, i32, i32) {
    %c0_i32 = arith.constant 0 : i32
    %c0_i32_0 = arith.constant 0 : i32
    %c0_i32_1 = arith.constant 0 : i32
    return %arg0, %c0_i32, %c0_i32_0 : i32, i32, i32
  }
  func.func @transform_11(%arg0: i32) -> (i32, i32) {
    %c0_i32 = arith.constant 0 : i32
    %c0_i32_0 = arith.constant 0 : i32
    %c0_i32_1 = arith.constant 0 : i32
    return %c0_i32, %c0_i32_0 : i32, i32
  }
  func.func @transform_12(%arg0: i32) -> (i32, i32) {
    %c0_i32 = arith.constant 0 : i32
    %c0_i32_0 = arith.constant 0 : i32
    %c0_i32_1 = arith.constant 0 : i32
    return %c0_i32, %c0_i32_0 : i32, i32
  }
}

</mosaic_0001>

<bundles_post_ra>
// kernel: tpu_custom_call.1
= control target key start
LH: loop header
LB: loop body
LE: loop exit
PB: predicated region body
PF: predicated region fallthrough
CT: control target
= control target key end

     0   :  { %s2857_s0 = inlined_call_operand.hbm [shape: f32[8,16,128], index: 0, kind: input, shape index: {}]   ;;  %s2858_s1 = inlined_call_operand.hbm [shape: f32[8,16,128], index: 1, kind: input, shape index: {}]   ;;  %s2859_s2 = inlined_call_operand.hbm [shape: f32[8,32], index: 2, kind: input, shape index: {}]   ;;  %s2860_s3 = inlined_call_operand.hbm [shape: f32[6,8,128], index: 3, kind: input, shape index: {}]   ;;  %s2861_s4 = inlined_call_operand.hbm [shape: f32[16,32], index: 4, kind: input, shape index: {}]   ;;  %s2862_s5 = inlined_call_operand.vmem [shape: f32[16,128], index: 5, kind: input, shape index: {}]   ;;  %s2863_s6 = inlined_call_operand.vmem [shape: f32[1,128], index: 6, kind: input, shape index: {}]   ;;  %s2864_s7 = inlined_call_operand.hbm [shape: f32[16,128], index: 7, kind: input, shape index: {}]   ;;  %s2865_s8 = inlined_call_operand.hbm [shape: f32[32,128], index: 8, kind: input, shape index: {}]   ;;  %s2866_s9 = inlined_call_operand.hbm [shape: f32[6,8,32], index: 9, kind: output, shape index: {0}]   ;;  %s2867_s10 = inlined_call_operand.hbm [shape: f32[6,8,128], index: 10, kind: output, shape index: {1}]   ;;  %s2868_s11 = inlined_call_operand.hbm [shape: f32[8,32], index: 11, kind: output, shape index: {2}]   ;;  %s2869_s12 = inlined_call_operand.hbm [shape: f32[8,32], index: 12, kind: output, shape index: {3}]  }
   0x1   :  { %2881 = sst [smem:[#allocation31_spill]] %s2857_s0 }
   0x2   :  { %2882 = sst [smem:[#allocation32_spill]] %s2858_s1 }
   0x3   :  { %2883 = sst [smem:[#allocation33_spill]] %s2866_s9 }
   0x4   :  { %2884 = sst [smem:[#allocation34_spill]] %s2867_s10 }
   0x5   :  { %2885 = sst [smem:[#allocation35_spill]] %s2868_s11 }
   0x6   :  { %2886 = sst [smem:[#allocation36_spill]] %s2869_s12 }
   0x7   :  { %18 = vsyncpa [#allocation5], 0 }
   0x8   :  { %19 = vsyncpa [#allocation8], 0 }
   0x9   :  { %20 = vsyncpa [#allocation11], 0 }
   0xa   :  { %22 = vsyncpa [#allocation11 + $0x1], 0 }
   0xb   :  { %23 = vsyncpa [#allocation14], 0 }
   0xc   :  { %24 = vsyncpa [#allocation6], 0 }
   0xd   :  { %26 = vsyncpa [#allocation6 + $0x1], 0 }
   0xe   :  { %27 = vsyncpa [#allocation18], 0 }
   0xf   :  { %29 = vsyncpa [#allocation18 + $0x1], 0 }
  0x10   :  { %30 = vsyncpa [#allocation21], 0  ;;  %s2292_s21 = smov 0   ;;  %s2294_s22 = smov 0  }
  0x11   :  { %s2296_s23 = smov 0   ;;  %s2298_s24 = smov 0  }
  0x12 LB: > { %s2313_s25 = sadd.s32 4294967295, %s2204_s24   ;;  %p1597_p0 = scmp.ge.s32.totalorder %s2204_s24, 1  ;;  %s2204_s24 = sphi %s2298_s24, %s2932_s24   ;;  %s2200_s23 = sphi %s2296_s23, %s2931_s23   ;;  %s2196_s22 = sphi %s2294_s22, %s2930_s22   ;;  %s2192_s21 = sphi %s2292_s21, %s2929_s21  }
  0x13   : > { %p2874_p1 = scmp.eq.s32.totalorder %s2313_s25, 0  ;;  %p329_p2 = scmp.lt.s32.totalorder %s2204_s24, 7 }
  0x14   : > { %s2206_s27 = smov [#allocation7]   ;;  %s2207_s29 = smov [#allocation12]  }
  0x15   : > { %p2319_p4 = pnand %p1597_p0, %p329_p2  ;;  %s354_s28 = sshll.u32 %s2206_s27, 4  ;;  %s2323_s28 = int_to_ptr.vmem [resolvable:$true] %s354_s28 }
  0x16   : > { %s378_s30 = sshll.u32 %s2207_s29, 4  ;;  %s2208_s14 = smov [#allocation13]   ;;  %s2333_s30 = int_to_ptr.vmem [resolvable:$true] %s378_s30 }
  0x17   : > { %s2887_s26 = scalar_select %p2319_p4, 1, 0 }
  0x18   : > { %p1707_p5 = pneg %p2319_p4  ;;  %s397_s15 = sshll.u32 %s2208_s14, 4  ;;  %s2335_s15 = int_to_ptr.vmem [resolvable:$true] %s397_s15 }
  0x19   : > { %s2889_s1 = sld [smem:[#allocation32_spill]] }
  0x1a   : > { %p2329_p6 = pnand %p1707_p5, %p2874_p1 }
  0x1c   : > { %p2345_p8 = pneg %p2329_p6 }
  0x1f   : > { %s1832_s18 = scalar_lea.hbm %s2889_s1, 2048 }
  0x20   : > { %p1833_p7 = scmp.ne.s32.totalorder %s2889_s1, %s1832_s18  ;;  %p1839_p11 = scmp.lt.u32.totalorder %s1832_s18, %s2889_s1 }
  0x22   : > { %p1835_p9 = pnand %p2345_p8, %p1833_p7 }
  0x24   : > { %p1836_p10 = pneg %p1835_p9 }
  0x26   : > { %p1841_p12 = pnand %p1839_p11, %p1836_p10 }
  0x28   : > { %1844 = shalt.err (!%p1841_p12)
}
  0x29   : > { %s1845_s16 = scalar_lea.vmem %s2323_s28, 2048  ;;  %p1853_p5 = scmp.lt.s32.totalorder %s2323_s28, %s2323_s28 }
  0x2a   : > { %p1846_p13 = scmp.ne.s32.totalorder %s2323_s28, %s1845_s16  ;;  %p1854_p3 = scmp.lt.s32.totalorder %s1845_s16, %s1845_s16 }
  0x2c   : > { %p1848_p0 = pnand %p1846_p13, %p2345_p8  ;;  %p1855_p7 = por %p1854_p3, %p1853_p5 }
  0x2e   : > { %p1849_p2 = pneg %p1848_p0 }
  0x30   : > { %p1856_p9 = pnand %p1855_p7, %p1849_p2 }
  0x32   : > { %1859 = shalt.err (!%p1856_p9)
}
  0x33   : > { %s2209_s17 = smov 128   ;;  %s2210_s18 = smov 8  }
  0x34   : > { %1713 = dma.hbm_to_vmem [thread:$0]  (!%p2329_p6), %s2889_s1, 2048, %s2323_s28, [#allocation8], %s2209_s17, %s2209_s17, %s2210_s18  }
  0x35   : > { %s1860_s16 = scalar_lea.hbm %s2861_s4, 256 }
  0x36   : > { %p1861_p3 = scmp.ne.s32.totalorder %s2861_s4, %s1860_s16  ;;  %p1867_p12 = scmp.lt.u32.totalorder %s1860_s16, %s2861_s4 }
  0x38   : > { %p1863_p10 = pnand %p1861_p3, %p2345_p8 }
  0x3a   : > { %p1864_p11 = pneg %p1863_p10 }
  0x3c   : > { %p1869_p13 = pnand %p1867_p12, %p1864_p11 }
  0x3e   : > { %1872 = shalt.err (!%p1869_p13)
}
  0x3f   : > { %s1873_s28 = scalar_lea.vmem %s2333_s30, 256  ;;  %p1881_p7 = scmp.lt.s32.totalorder %s2333_s30, %s2333_s30 }
  0x40   : > { %p1874_p0 = scmp.ne.s32.totalorder %s2333_s30, %s1873_s28  ;;  %p1882_p9 = scmp.lt.s32.totalorder %s1873_s28, %s1873_s28 }
  0x42   : > { %p1876_p2 = pnand %p1874_p0, %p2345_p8  ;;  %p1883_p3 = por %p1882_p9, %p1881_p7 }
  0x44   : > { %p1877_p5 = pneg %p1876_p2 }
  0x46   : > { %p1884_p10 = pnand %p1883_p3, %p1877_p5 }
  0x48   : > { %1887 = shalt.err (!%p1884_p10)
}
  0x49   : > { %1719 = dma.hbm_to_vmem [thread:$0]  (!%p2329_p6), %s2861_s4, 256, %s2333_s30, [#allocation11], %s2209_s17, %s2209_s17, %s2210_s18  }
  0x4a   : > { %s1888_s19 = scalar_lea.hbm %s2864_s7, 256 }
  0x4b   : > { %p1889_p11 = scmp.ne.s32.totalorder %s2864_s7, %s1888_s19  ;;  %p1895_p0 = scmp.lt.u32.totalorder %s1888_s19, %s2864_s7 }
  0x4d   : > { %p1891_p12 = pnand %p1889_p11, %p2345_p8 }
  0x4f   : > { %p1892_p13 = pneg %p1891_p12 }
  0x51   : > { %p1897_p2 = pnand %p1895_p0, %p1892_p13 }
  0x53   : > { %1900 = shalt.err (!%p1897_p2)
}
  0x54   : > { %s1901_s30 = scalar_lea.vmem %s2335_s15, 256  ;;  %p1909_p3 = scmp.lt.s32.totalorder %s2335_s15, %s2335_s15 }
  0x55   : > { %p1902_p5 = scmp.ne.s32.totalorder %s2335_s15, %s1901_s30  ;;  %p1910_p10 = scmp.lt.s32.totalorder %s1901_s30, %s1901_s30 }
  0x57   : > { %p1904_p7 = pnand %p1902_p5, %p2345_p8  ;;  %p1911_p11 = por %p1910_p10, %p1909_p3 }
  0x59   : > { %p1905_p9 = pneg %p1904_p7 }
  0x5b   : > { %p1912_p12 = pnand %p1911_p11, %p1905_p9 }
  0x5d   : > { %1915 = shalt.err (!%p1912_p12)
}
  0x5e   : > { %1722 = dma.hbm_to_vmem [thread:$0]  (!%p2329_p6), %s2864_s7, 256, %s2335_s15, [#allocation14], %s2209_s17, %s2209_s17, %s2210_s18  }
  0x5f   : > { %s2211_s10 = smov [#allocation4]   ;;  %s2212_s12 = smov [#allocation9]  }
  0x60   : > { %s341_s11 = sshll.u32 %s2211_s10, 4  ;;  %s368_s19 = sshll.u32 %s2212_s12, 4  ;;  %s342_s11 = int_to_ptr.vmem [resolvable:$true] %s341_s11  ;;  %s369_s19 = int_to_ptr.vmem [resolvable:$true] %s368_s19 }
  0x61   : > { %s2891_s0 = sld [smem:[#allocation31_spill]] }
  0x67   : > { %s1916_s14 = scalar_lea.hbm %s2891_s0, 2048 }
  0x68   : > { %p1917_p13 = scmp.ne.s32.totalorder %s2891_s0, %s1916_s14  ;;  %p1923_p5 = scmp.lt.u32.totalorder %s1916_s14, %s2891_s0 }
  0x6a   : > { %p1919_p0 = pnand %p1917_p13, %p2345_p8 }
  0x6c   : > { %p1920_p2 = pneg %p1919_p0 }
  0x6e   : > { %p1925_p7 = pnand %p1923_p5, %p1920_p2 }
  0x70   : > { %1928 = shalt.err (!%p1925_p7)
}
  0x71   : > { %s1929_s15 = scalar_lea.vmem %s342_s11, 2048  ;;  %p1937_p11 = scmp.lt.s32.totalorder %s342_s11, %s342_s11 }
  0x72   : > { %p1930_p9 = scmp.ne.s32.totalorder %s342_s11, %s1929_s15  ;;  %p1938_p12 = scmp.lt.s32.totalorder %s1929_s15, %s1929_s15 }
  0x74   : > { %p1932_p3 = pnand %p1930_p9, %p2345_p8  ;;  %p1939_p1 = por %p1938_p12, %p1937_p11 }
  0x76   : > { %p1933_p10 = pneg %p1932_p3 }
  0x78   : > { %p1940_p4 = pnand %p1939_p1, %p1933_p10 }
  0x7a   : > { %1943 = shalt.err (!%p1940_p4)
}
  0x7b   : > { %1710 = dma.hbm_to_vmem [thread:$0]  (!%p2329_p6), %s2891_s0, 2048, %s342_s11, [#allocation5], %s2209_s17, %s2209_s17, %s2210_s18  }
  0x7c   : > { %s1944_s20 = scalar_lea.hbm %s2859_s2, 128 }
  0x7d   : > { %p1945_p1 = scmp.ne.s32.totalorder %s2859_s2, %s1944_s20  ;;  %p1951_p0 = scmp.lt.u32.totalorder %s1944_s20, %s2859_s2 }
  0x7f   : > { %p1947_p4 = pnand %p1945_p1, %p2345_p8 }
  0x81   : > { %p1948_p13 = pneg %p1947_p4 }
  0x83   : > { %p1953_p2 = pnand %p1951_p0, %p1948_p13 }
  0x85   : > { %1956 = shalt.err (!%p1953_p2)
}
  0x86   : > { %s1957_s28 = scalar_lea.vmem %s369_s19, 128  ;;  %p1965_p3 = scmp.lt.s32.totalorder %s369_s19, %s369_s19 }
  0x87   : > { %p1958_p5 = scmp.ne.s32.totalorder %s369_s19, %s1957_s28  ;;  %p1966_p10 = scmp.lt.s32.totalorder %s1957_s28, %s1957_s28 }
  0x89   : > { %p1960_p7 = pnand %p1958_p5, %p2345_p8  ;;  %p1967_p11 = por %p1966_p10, %p1965_p3 }
  0x8b   : > { %p1961_p9 = pneg %p1960_p7 }
  0x8d   : > { %p1968_p12 = pnand %p1967_p11, %p1961_p9 }
  0x8f   : > { %1971 = shalt.err (!%p1968_p12)
}
  0x90   : > { %1716 = dma.hbm_to_vmem [thread:$0]  (!%p2329_p6), %s2859_s2, 128, %s369_s19, [#allocation8]  }
  0x91   : > { %s2213_s1 = smov [#allocation15]   ;;  %s1972_s20 = scalar_lea.hbm %s2865_s8, 512 }
  0x92   : > { %s410_s9 = sshll.u32 %s2213_s1, 4  ;;  %p1973_p1 = scmp.ne.s32.totalorder %s2865_s8, %s1972_s20  ;;  %s411_s9 = int_to_ptr.vmem [resolvable:$true] %s410_s9 }
  0x93   : > { %p1979_p0 = scmp.lt.u32.totalorder %s1972_s20, %s2865_s8 }
  0x94   : > { %p1975_p4 = pnand %p1973_p1, %p2345_p8 }
  0x96   : > { %p1976_p13 = pneg %p1975_p4 }
  0x98   : > { %p1981_p2 = pnand %p1979_p0, %p1976_p13 }
  0x9a   : > { %1984 = shalt.err (!%p1981_p2)
}
  0x9b   : > { %s1985_s19 = scalar_lea.vmem %s411_s9, 512  ;;  %p1993_p3 = scmp.lt.s32.totalorder %s411_s9, %s411_s9 }
  0x9c   : > { %p1986_p5 = scmp.ne.s32.totalorder %s411_s9, %s1985_s19  ;;  %p1994_p10 = scmp.lt.s32.totalorder %s1985_s19, %s1985_s19 }
  0x9e   : > { %p1988_p7 = pnand %p1986_p5, %p2345_p8  ;;  %p1995_p11 = por %p1994_p10, %p1993_p3 }
  0xa0   : > { %p1989_p9 = pneg %p1988_p7 }
  0xa2   : > { %p1996_p12 = pnand %p1995_p11, %p1989_p9 }
  0xa4   : > { %1999 = shalt.err (!%p1996_p12)
}
  0xa5   : > { %1725 = dma.hbm_to_vmem [thread:$0]  (!%p2329_p6), %s2865_s8, 512, %s411_s9, [#allocation14], %s2209_s17, %s2209_s17, %s2210_s18  }
  0xa6   : > { %s2876_s13 = sadd.s32 4294967294, %s2204_s24   ;;  %s2483_s27 = sadd.s32 1, %s2204_s24  }
  0xa7   : > { %s103_s15 = ssub.s32 %s2204_s24, %s2483_s27  ;;  %s106_s1 = sadd.s32 1, %s2200_s23 }
  0xa8   : > { %p104_p8 = scmp.eq.s32.totalorder %s103_s15, 0  ;;  %p113_p1 = scmp.ne.s32.totalorder %s2200_s23, %s2196_s22 }
  0xa9   : > { %p114_p4 = scmp.eq.s32.totalorder %s2204_s24, 0  ;;  %p119_p13 = scmp.ne.s32.totalorder %s2196_s22, %s2192_s21 }
  0xaa   : > { %s2494_s10 = scalar_select %p104_p8, %s2200_s23, %s106_s1  }
  0xab   : > { %p2496_p0 = por %p114_p4, %p113_p1  ;;  %p2893_p6 = scmp.eq.s32.totalorder %s2313_s25, 0 }
  0xac   : > { %p2877_p5 = scmp.eq.s32.totalorder %s2313_s25, 5  ;;  %p254_p7 = scmp.eq.s32.totalorder %s2876_s13, 5 }
  0xad   : > { %p2502_p2 = por %p2893_p6, %p119_p13  ;;  %p1743_p9 = scmp.lt.s32.totalorder %s2204_s24, 6 }
  0xae   : > { %s424_s18 = sand.u32 1, %s2204_s24   ;;  %p2513_p3 = por %p2877_p5, %p113_p1 }
  0xaf   : > { %p2517_p10 = por %p254_p7, %p119_p13  ;;  %s426_s29 = sand.u32 1, %s2200_s23  }
  0xb0   : > { %s2895_s9 = scalar_select %p2513_p3, 1, 0 }
  0xb1   : > { %s2896_s20 = scalar_select %p2517_p10, 1, 0 }
  0xb2   : > { %s1605_s14 = sshll.u32 %s426_s29, 3  ;;  %s1606_s16 = sshll.u32 %s2204_s24, 7 }
  0xb3   : > { %s2526_s28 = scalar_lea.hbm %s2860_s3, %s1606_s16  ;;  %s428_s11 = scalar_lea.vmem [#allocation10], %s1605_s14 }
  0xb4   : > { %s435_s15 = sshll.u32 %s428_s11, 4  ;;  %p2530_p11 = pnand %p1743_p9, %p2496_p0  ;;  %s2534_s15 = int_to_ptr.vmem [resolvable:$true] %s435_s15 }
  0xb5   : > { %s425_s29 = scalar_lea.sflag [#allocation11], %s424_s18  ;;  %s2000_s13 = scalar_lea.hbm %s2526_s28, 128 }
  0xb6   : > { %p2001_p12 = scmp.ne.s32.totalorder %s2526_s28, %s2000_s13  ;;  %p2002_p8 = pneg %p2530_p11 }
  0xb7   : > { %s2005_s12 = scalar_lea.hbm %s2860_s3, 768  ;;  %p2006_p13 = scmp.lt.u32.totalorder %s2526_s28, %s2860_s3 }
  0xb8   : > { %p2003_p1 = pnand %p2002_p8, %p2001_p12  ;;  %p2007_p0 = scmp.lt.u32.totalorder %s2005_s12, %s2000_s13 }
  0xb9   : > { %p2009_p7 = scmp.lt.u32.totalorder %s2000_s13, %s2526_s28 }
  0xba   : > { %p2004_p4 = pneg %p2003_p1  ;;  %p2008_p6 = por %p2007_p0, %p2006_p13 }
  0xbc   : > { %p2010_p9 = por %p2009_p7, %p2008_p6 }
  0xbe   : > { %p2011_p5 = pnand %p2010_p9, %p2004_p4 }
  0xc0   : > { %2014 = shalt.err (!%p2011_p5)
}
  0xc1   : > { %s2015_s18 = scalar_lea.vmem %s2534_s15, 128  ;;  %s2214_s11 = smov [#allocation10]  }
  0xc2   : > { %p2016_p12 = scmp.ne.s32.totalorder %s2534_s15, %s2015_s18  ;;  %s2020_s14 = sshll.u32 %s2214_s11, 4  ;;  %s2021_s14 = int_to_ptr.vmem [resolvable:$false] %s2020_s14 }
  0xc3   : > { %s2022_s16 = scalar_lea.vmem %s2021_s14, 256  ;;  %p2023_p3 = scmp.lt.s32.totalorder %s2534_s15, %s2021_s14 }
  0xc4   : > { %p2018_p1 = pnand %p2016_p12, %p2002_p8  ;;  %p2024_p13 = scmp.lt.s32.totalorder %s2022_s16, %s2015_s18 }
  0xc6   : > { %p2019_p10 = pneg %p2018_p1  ;;  %p2025_p0 = por %p2024_p13, %p2023_p3 }
  0xc8   : > { %p2026_p6 = pnand %p2025_p0, %p2019_p10 }
  0xca   : > { %2029 = shalt.err (!%p2026_p6)
}
  0xcb   : > { %1729 = dma.hbm_to_vmem [thread:$0]  (!%p2530_p11), %s2526_s28, 128, %s2534_s15, %s425_s29  }
  0xcc   : > { %p2898_p5 = scmp.ne.s32.totalorder %s2887_s26, 0 }
  0xcd   : > { %p2899_p8 = scmp.eq.s32.totalorder (!%p2898_p5), %s2313_s25, 0 }
  0xce   : > { %444 = sbr.rel (%p2898_p5) target bundleno = 1704 (0x6a8), region = 56 }
  0xd5   : > { %2155 = dma.done.wait (%p2899_p8), [#allocation5], 2048   ;;  %p2900_p4 = pmov %p2899_p8 }
  0xd7   : > { %2157 = vsyncadd (%p2900_p4), [#allocation5], 4294965248  ;;  %p2901_p7 = pmov %p2900_p4 }
  0xd8   : > { %p2902_p3 = pmov %p2900_p4 }
  0xd9   : > { %2159 = dma.done.wait (%p2901_p7), [#allocation8], 2176  }
  0xda   : > { %2161 = vsyncadd (%p2902_p3), [#allocation8], 4294965120  ;;  %s458_s13 = sand.u32 1, %s2313_s25   ;;  %s2879_s26 = sand.u32 1, %s2196_s22  }
  0xdb   : > { %s2575_s28 = sshll.u32 %s2879_s26, 3  ;;  %s459_s15 = scalar_lea.sflag [#allocation11], %s458_s13 }
  0xdc   : > { %s462_s1 = scalar_lea.vmem [#allocation10], %s2575_s28 }
  0xdd   : > { %2163 = dma.done.wait (%p2502_p2), %s459_s15, 128  }
  0xde   : > { %2165 = vsyncadd (%p2502_p2), %s459_s15, 4294967168  ;;  %p2903_p10 = pmov %p2902_p3 }
  0xdf   : > { %p2904_p11 = pmov %p2902_p3 }
  0xe0   : > { %2167 = dma.done.wait (%p2903_p10), [#allocation11], 256  }
  0xe1   : > { %2169 = vsyncadd (%p2904_p11), [#allocation11], 4294967040  ;;  %p2905_p9 = pmov %p2902_p3 }
  0xe2   : > { %p2906_p12 = pmov %p2902_p3 }
  0xe3   : > { %2171 = dma.done.wait (%p2905_p9), [#allocation14], 768  }
  0xe4   : > { %2173 = vsyncadd (%p2906_p12), [#allocation14], 4294966528  ;;  %s515_s12 = scalar_lea.vmem [#allocation17], %s2575_s28  ;;  %p2907_p1 = scmp.ne.s32.totalorder %s2313_s25, 0 }
  0xe5   : > { %vm524_vm0 = vcmask (!%p2907_p1), 261120   ;;  %v526_v0 = vld [vmem:[#allocation9] sm:$0xff] (!%p2907_p1)  ;;  %v2215_v1 = vmov (!%p2907_p1), 0.0  }
  0xe6   : > { %523 = sbr.rel (%p2907_p1) target bundleno = 237 (0xed), region = 88  ;;  %525 = vst.msk [vmem:[#allocation2] sm:$0xff] (!%p2907_p1), %vm524_vm0, %v2215_v1  ;;  %527 = vst.msk [vmem:[#allocation3] sm:$0xff] (!%p2907_p1), %vm524_vm0, %v526_v0 }
  0xed PF: > { %v572_v2 = vlaneseq  ;;  %v2216_v3 = vmov 1966171168   ;;  %v2596_v5 = vld [vmem:[#allocation2] sm:$0xff]  ;;  %v563_v16 = vld [vmem:[#allocation12 + $0x8] sm:$0xff]  ;;  %v562_v17 = vld [vmem:[#allocation12] sm:$0xff]  ;;  %vm673_vm1 = vcmask 261120  }
  0xee   : > { %v570_v4 = vunpack.c.l.s4 %v2216_v3  ;;  %v568_v8 = vcombine.high %v2596_v5, %v2596_v5  ;;  %v531_v1 = vld [vmem:[#allocation4 + $0x8] sm:$0xff]  ;;  %v530_v3 = vld [vmem:[#allocation4] sm:$0xff]  ;;  %vm849_vm2 = vcmask 1041409   ;;  %vm852_vm3 = vcmask 1042434   ;;  %s2880_s16 = smov 32   ;;  %s2221_s15 = smov 64  }
  0xef   : > { %v2599_v6 = vshrl.u32 %v572_v2, 7  ;;  %vm855_vm4 = vcmask 1043459   ;;  %vm858_vm5 = vcmask 1044484   ;;  %vm861_vm6 = vcmask 1045509   ;;  %s1624_s17 = sshll.u32 %s2313_s25, 7  ;;  %s2908_s18 = sld [smem:[#allocation34_spill]] }
  0xf0   : > { %v571_v7 = vunpack.c.0.s8 %v570_v4  ;;  %vm864_vm7 = vcmask 1046534   ;;  %vm867_vm8 = vcmask 1047559   ;;  %vm2218_vm9 = vmmov 0   ;;  %s1392_s14 = sshll.u32 %s515_s12, 4  ;;  %s1366_s26 = scalar_lea.sflag [#allocation18], %s458_s13  ;;  %s1393_s14 = int_to_ptr.vmem [resolvable:$true] %s1392_s14 }
  0xf1   : > { %v2606_v11 = vsub.s32 0, %v2599_v6  ;;  %vm1072_vm10 = vcmask 130112   ;;  %vm1144_vm11 = vcmask 130048   ;;  %s2030_s29 = scalar_lea.vmem %s1393_s14, 128  ;;  %p2909_p13 = scmp.ne.s32.totalorder %s2895_s9, 0 }
  0xf2   : > { %v574_v9 = vsub.s32 %v571_v7, %v2599_v6  ;;  %p2031_p2 = scmp.ne.s32.totalorder %s1393_s14, %s2030_s29 }
  0xf4   : > { %v575_v10 = vrot.slane %v2596_v5, %v574_v9  ;;  %v582_v12 = vrot.slane %v568_v8, %v574_v9  ;;  %p2032_p0 = pnand %p2031_p2, %p2909_p13 }
  0xf5   : > { %s2722_s11 = scalar_lea.hbm %s2908_s18, %s1624_s17 }
  0xf6   : > { %v591_v13 = vrot.slane %v575_v10, %v574_v9  ;;  %v598_v14 = vrot.slane %v582_v12, %v574_v9  ;;  %v583_v15 = vcombine.high %v575_v10, %v575_v10  ;;  %v584_v22 = vcombine.high %v582_v12, %v582_v12  ;;  %v539_v10 = vld [vmem:[#allocation4 + $0x48] sm:$0xff]  ;;  %v538_v12 = vld [vmem:[#allocation4 + $0x40] sm:$0xff]  ;;  %p2033_p6 = pneg %p2032_p0 }
  0xf8   : > { %v620_v18 = vrot.slane %v591_v13, %v2606_v11  ;;  %v636_v19 = vrot.slane %v598_v14, %v2606_v11  ;;  %v613_v20 = vcombine.high %v591_v13, %v591_v13  ;;  %v605_v21 = vrot.slane %v583_v15, %v574_v9  ;;  %v2635_v15 = vld [vmem:[%s2862_s5 + $0x8] sm:$0xff] }
  0xf9   : > { %v612_v31 = vrot.slane %v584_v22, %v574_v9  ;;  %v614_v43 = vcombine.high %v598_v14, %v598_v14 }
  0xfa   : > { %v658_v23 = vmul.f32 %v620_v18, %v563_v16  ;;  %v657_v24 = vmul.f32 %v620_v18, %v562_v17  ;;  %v666_v25 = vmul.f32 %v636_v19, %v563_v16  ;;  %v665_v26 = vmul.f32 %v636_v19, %v562_v17 }
  0xfb   : > { %v628_v27 = vrot.slane %v613_v20, %v2606_v11  ;;  %v624_v28 = vrot.slane %v605_v21, %v2606_v11  ;;  %v640_v36 = vrot.slane %v612_v31, %v2606_v11  ;;  %v615_v37 = vcombine.high %v605_v21, %v605_v21  ;;  %v534_v21 = vld [vmem:[#allocation4 + $0x20] sm:$0xff] }
  0xfc   : > { %v677_v29 = vsel %vm673_vm1, %v658_v23, 0.0  ;;  %v674_v30 = vsel %vm673_vm1, %v657_v24, 0.0  ;;  %v701_v32 = vsel %vm673_vm1, %v666_v25, 0.0  ;;  %v698_v33 = vsel %vm673_vm1, %v665_v26, 0.0  ;;  %v532_v26 = vld [vmem:[#allocation4 + $0x10] sm:$0xff] }
  0xfd   : > { %678 = vadd.xlane.f32.xlu1 %v677_v29  ;;  %675 = vadd.xlane.f32.xlu0 %v674_v30  ;;  %v661_v34 = vmul.f32 %v628_v27, %v562_v17  ;;  %v659_v35 = vmul.f32 %v624_v28, %v562_v17  ;;  %v662_v40 = vmul.f32 %v628_v27, %v563_v16 }
  0xfe   : > { %v660_v41 = vmul.f32 %v624_v28, %v563_v16  ;;  %v668_v42 = vmul.f32 %v640_v36, %v563_v16  ;;  %v667_v46 = vmul.f32 %v640_v36, %v562_v17  ;;  %v632_v47 = vrot.slane %v615_v37, %v2606_v11  ;;  %v533_v36 = vld [vmem:[#allocation4 + $0x18] sm:$0xff] }
  0xff   : > { %v686_v38 = vsel %vm673_vm1, %v661_v34, 0.0  ;;  %v680_v39 = vsel %vm673_vm1, %v659_v35, 0.0  ;;  %v689_v44 = vsel %vm673_vm1, %v662_v40, 0.0  ;;  %v644_v49 = vrot.slane %v614_v43, %v2606_v11  ;;  %v541_v43 = vld [vmem:[#allocation4 + $0x58] sm:$0xff] }
 0x100   : > { %v683_v45 = vsel %vm673_vm1, %v660_v41, 0.0  ;;  %v707_v48 = vsel %vm673_vm1, %v668_v42, 0.0  ;;  %v704_v50 = vsel %vm673_vm1, %v667_v46, 0.0  ;;  %v664_v51 = vmul.f32 %v632_v47, %v563_v16 }
 0x101   : > { %702 = vadd.xlane.f32.xlu1 %v701_v32  ;;  %699 = vadd.xlane.f32.xlu0 %v698_v33  ;;  %v663_v52 = vmul.f32 %v632_v47, %v562_v17  ;;  %v616_v53 = vcombine.high %v612_v31, %v612_v31  ;;  %v670_v54 = vmul.f32 %v644_v49, %v563_v16  ;;  %v535_v33 = vld [vmem:[#allocation4 + $0x28] sm:$0xff]  ;;  %v540_v47 = vld [vmem:[#allocation4 + $0x50] sm:$0xff] }
 0x102   : > { %v695_v55 = vsel %vm673_vm1, %v664_v51, 0.0  ;;  %v669_v57 = vmul.f32 %v644_v49, %v562_v17 }
 0x103   : > { %v692_v56 = vsel %vm673_vm1, %v663_v52, 0.0  ;;  %v648_v58 = vrot.slane %v616_v53, %v2606_v11  ;;  %v713_v59 = vsel %vm673_vm1, %v670_v54, 0.0 }
 0x104   : > { %v710_v60 = vsel %vm673_vm1, %v669_v57, 0.0 }
 0x105   : > { %687 = vadd.xlane.f32.xlu1 %v686_v38  ;;  %681 = vadd.xlane.f32.xlu0 %v680_v39  ;;  %v672_v61 = vmul.f32 %v648_v58, %v563_v16  ;;  %v671_v62 = vmul.f32 %v648_v58, %v562_v17  ;;  %v2640_v16 = vld [vmem:[%s2862_s5] sm:$0xff] }
 0x107   : > { %v719_v63 = vsel %vm673_vm1, %v672_v61, 0.0  ;;  %v716_v0 = vsel %vm673_vm1, %v671_v62, 0.0  ;;  %v537_v61 = vld [vmem:[#allocation4 + $0x38] sm:$0xff]  ;;  %v536_v62 = vld [vmem:[#allocation4 + $0x30] sm:$0xff] }
 0x109   : > { %690 = vadd.xlane.f32.xlu1 %v689_v44  ;;  %684 = vadd.xlane.f32.xlu0 %v683_v45 }
 0x10d   : > { %708 = vadd.xlane.f32.xlu1 %v707_v48  ;;  %705 = vadd.xlane.f32.xlu0 %v704_v50 }
 0x111   : > { %696 = vadd.xlane.f32.xlu1 %v695_v55  ;;  %693 = vadd.xlane.f32.xlu0 %v692_v56 }
 0x115   : > { %714 = vadd.xlane.f32.xlu1 %v713_v59  ;;  %711 = vadd.xlane.f32.xlu0 %v710_v60 }
 0x119   : > { %720 = vadd.xlane.f32.xlu1 %v719_v63  ;;  %717 = vadd.xlane.f32.xlu0 %v716_v0 }
 0x18a   : > { %v679_v4 = vpop.xlane.xlu1 %678  ;;  %v676_v7 = vpop.xlane.xlu0 %675 }
 0x18b   : > { %v723_v8 = vadd.f32 %v679_v4, %v531_v1  ;;  %v722_v9 = vadd.f32 %v676_v7, %v530_v3 }
 0x18d   : > { %v739_v13 = vmax.f32 %v723_v8, 0.0  ;;  %v738_v14 = vmax.f32 %v722_v9, 0.0 }
 0x18e   : > { %v703_v17 = vpop.xlane.xlu1 %702  ;;  %v700_v18 = vpop.xlane.xlu0 %699 }
 0x18f   : > { %v731_v19 = vadd.f32 %v703_v17, %v539_v10  ;;  %v730_v20 = vadd.f32 %v700_v18, %v538_v12  ;;  %v755_v22 = vmul.f32 %v739_v13, %v2635_v15  ;;  %v754_v23 = vmul.f32 %v738_v14, %v2640_v16  ;;  %v543_v13 = vld [vmem:[#allocation4 + $0x68] sm:$0xff]  ;;  %v542_v14 = vld [vmem:[#allocation4 + $0x60] sm:$0xff] }
 0x191   : > { %v747_v24 = vmax.f32 %v731_v19, 0.0  ;;  %v746_v25 = vmax.f32 %v730_v20, 0.0  ;;  %v770_v34 = vadd.f32 %v755_v22, %v754_v23 }
 0x192   : > { %v688_v27 = vpop.xlane.xlu1 %687  ;;  %v682_v28 = vpop.xlane.xlu0 %681 }
 0x193   : > { %v763_v29 = vmul.f32 %v747_v24, %v2635_v15  ;;  %v762_v30 = vmul.f32 %v746_v25, %v2640_v16  ;;  %v726_v31 = vadd.f32 %v688_v27, %v534_v21  ;;  %v724_v32 = vadd.f32 %v682_v28, %v532_v26 }
 0x194   : > { %v771_v44 = vrot.slane %v770_v34, 4 }
 0x195   : > { %v798_v35 = vadd.f32 %v763_v29, %v762_v30  ;;  %v742_v39 = vmax.f32 %v726_v31, 0.0  ;;  %v740_v41 = vmax.f32 %v724_v32, 0.0 }
 0x196   : > { %v691_v37 = vpop.xlane.xlu1 %690  ;;  %v685_v38 = vpop.xlane.xlu0 %684  ;;  %v772_v57 = vadd.f32 %v771_v44, %v770_v34 }
 0x197   : > { %v727_v40 = vadd.f32 %v691_v37, %v535_v33  ;;  %v725_v42 = vadd.f32 %v685_v38, %v533_v36  ;;  %v799_v45 = vrot.slane %v798_v35, 4  ;;  %v758_v51 = vmul.f32 %v742_v39, %v2640_v16  ;;  %v545_v33 = vld [vmem:[#allocation4 + $0x78] sm:$0xff]  ;;  %v544_v38 = vld [vmem:[#allocation4 + $0x70] sm:$0xff] }
 0x198   : > { %v756_v54 = vmul.f32 %v740_v41, %v2640_v16  ;;  %v773_v17 = vrot.slane %v772_v57, 2 }
 0x199   : > { %v743_v46 = vmax.f32 %v727_v40, 0.0  ;;  %v741_v48 = vmax.f32 %v725_v42, 0.0  ;;  %v800_v58 = vadd.f32 %v799_v45, %v798_v35 }
 0x19a   : > { %v709_v49 = vpop.xlane.xlu1 %708  ;;  %v706_v50 = vpop.xlane.xlu0 %705  ;;  %v774_v34 = vadd.f32 %v773_v17, %v772_v57 }
 0x19b   : > { %v759_v52 = vmul.f32 %v743_v46, %v2635_v15  ;;  %v733_v53 = vadd.f32 %v709_v49, %v541_v43  ;;  %v757_v55 = vmul.f32 %v741_v48, %v2635_v15  ;;  %v732_v56 = vadd.f32 %v706_v50, %v540_v47 }
 0x19c   : > { %v801_v18 = vrot.slane %v800_v58, 2 }
 0x19d   : > { %v784_v59 = vadd.f32 %v759_v52, %v758_v51  ;;  %v749_v60 = vmax.f32 %v733_v53, 0.0  ;;  %v777_v63 = vadd.f32 %v757_v55, %v756_v54  ;;  %v748_v0 = vmax.f32 %v732_v56, 0.0 }
 0x19e   : > { %v697_v1 = vpop.xlane.xlu1 %696  ;;  %v694_v3 = vpop.xlane.xlu0 %693  ;;  %v802_v39 = vadd.f32 %v801_v18, %v800_v58  ;;  %v775_v53 = vrot.slane %v774_v34, 1 }
 0x19f   : > { %v785_v4 = vrot.slane %v784_v59, 4  ;;  %v765_v7 = vmul.f32 %v749_v60, %v2635_v15  ;;  %v778_v8 = vrot.slane %v777_v63, 4  ;;  %v764_v9 = vmul.f32 %v748_v0, %v2640_v16  ;;  %v1618_v60 = vld [vmem:[%s2863_s6] ss:$0 sm:$0xff] }
 0x1a0   : > { %v729_v10 = vadd.f32 %v697_v1, %v537_v61  ;;  %v728_v12 = vadd.f32 %v694_v3, %v536_v62  ;;  %v803_v61 = vrot.slane %v802_v39, 1 }
 0x1a1   : > { %v786_v19 = vadd.f32 %v785_v4, %v784_v59  ;;  %v779_v20 = vadd.f32 %v778_v8, %v777_v63  ;;  %v805_v21 = vadd.f32 %v765_v7, %v764_v9  ;;  %v776_v8 = vadd.f32 %v775_v53, %v774_v34 }
 0x1a2   : > { %v745_v22 = vmax.f32 %v729_v10, 0.0  ;;  %v744_v23 = vmax.f32 %v728_v12, 0.0  ;;  %v715_v24 = vpop.xlane.xlu1 %714  ;;  %v712_v25 = vpop.xlane.xlu0 %711 }
 0x1a3   : > { %v787_v26 = vrot.slane %v786_v19, 2  ;;  %v735_v27 = vadd.f32 %v715_v24, %v543_v13  ;;  %v734_v28 = vadd.f32 %v712_v25, %v542_v14  ;;  %v780_v29 = vrot.slane %v779_v20, 2 }
 0x1a4   : > { %v806_v30 = vrot.slane %v805_v21, 4  ;;  %v761_v31 = vmul.f32 %v745_v22, %v2635_v15  ;;  %v760_v32 = vmul.f32 %v744_v23, %v2640_v16  ;;  %v804_v13 = vadd.f32 %v803_v61, %v802_v39 }
 0x1a5   : > { %v788_v35 = vadd.f32 %v787_v26, %v786_v19  ;;  %v751_v36 = vmax.f32 %v735_v27, 0.0  ;;  %v750_v37 = vmax.f32 %v734_v28, 0.0  ;;  %v781_v40 = vadd.f32 %v780_v29, %v779_v20 }
 0x1a6   : > { %v807_v41 = vadd.f32 %v806_v30, %v805_v21  ;;  %v791_v42 = vadd.f32 %v761_v31, %v760_v32  ;;  %v721_v43 = vpop.xlane.xlu1 %720  ;;  %v718_v44 = vpop.xlane.xlu0 %717  ;;  %v832_v22 = vadd.f32 %v1618_v60, %v776_v8  ;;  %v836_v25 = vadd.f32 %v1618_v60, %v804_v13 }
 0x1a7   : > { %v789_v45 = vrot.slane %v788_v35, 1  ;;  %v767_v46 = vmul.f32 %v751_v36, %v2635_v15  ;;  %v766_v47 = vmul.f32 %v750_v37, %v2640_v16  ;;  %v737_v48 = vadd.f32 %v721_v43, %v545_v33 }
 0x1a8   : > { %v782_v49 = vrot.slane %v781_v40, 1  ;;  %v808_v50 = vrot.slane %v807_v41, 2  ;;  %v792_v51 = vrot.slane %v791_v42, 4  ;;  %v736_v52 = vadd.f32 %v718_v44, %v544_v38 }
 0x1a9   : > { %v812_v54 = vadd.f32 %v767_v46, %v766_v47  ;;  %v753_v55 = vmax.f32 %v737_v48, 0.0  ;;  %v790_v62 = vadd.f32 %v789_v45, %v788_v35  ;;  %v857_v36 = vrot.slane %v836_v25, 4 }
 0x1aa   : > { %v783_v56 = vadd.f32 %v782_v49, %v781_v40  ;;  %v809_v57 = vadd.f32 %v808_v50, %v807_v41  ;;  %v793_v58 = vadd.f32 %v792_v51, %v791_v42  ;;  %v752_v59 = vmax.f32 %v736_v52, 0.0 }
 0x1ab   : > { %v813_v63 = vrot.slane %v812_v54, 4  ;;  %v769_v0 = vmul.f32 %v753_v55, %v2635_v15  ;;  %v834_v14 = vadd.f32 %v1618_v60, %v790_v62 }
 0x1ac   : > { %v833_v1 = vadd.f32 %v1618_v60, %v783_v56  ;;  %v794_v3 = vrot.slane %v793_v58, 2  ;;  %v768_v4 = vmul.f32 %v752_v59, %v2640_v16  ;;  %v810_v9 = vrot.slane %v809_v57, 1 }
 0x1ad   : > { %v814_v7 = vadd.f32 %v813_v63, %v812_v54  ;;  %v851_v26 = vrot.slane %v834_v14, 6 }
 0x1ae   : > { %v795_v10 = vadd.f32 %v794_v3, %v793_v58  ;;  %v819_v12 = vadd.f32 %v769_v0, %v768_v4  ;;  %v848_v18 = vrot.slane %v833_v1, 7  ;;  %v811_v23 = vadd.f32 %v810_v9, %v809_v57 }
 0x1af   : > { %v815_v17 = vrot.slane %v814_v7, 2 }
 0x1b0   : > { %v796_v19 = vrot.slane %v795_v10, 1  ;;  %v820_v20 = vrot.slane %v819_v12, 4  ;;  %v850_v29 = vsel %vm849_vm2, %v848_v18, %v832_v22  ;;  %v837_v32 = vadd.f32 %v1618_v60, %v811_v23 }
 0x1b1   : > { %v816_v21 = vadd.f32 %v815_v17, %v814_v7  ;;  %v853_v35 = vsel %vm852_vm3, %v851_v26, %v850_v29 }
 0x1b2   : > { %v797_v15 = vadd.f32 %v796_v19, %v795_v10  ;;  %v821_v24 = vadd.f32 %v820_v20, %v819_v12  ;;  %v860_v41 = vrot.slane %v837_v32, 3 }
 0x1b3   : > { %v817_v16 = vrot.slane %v816_v21, 1 }
 0x1b4   : > { %v835_v27 = vadd.f32 %v1618_v60, %v797_v15  ;;  %v822_v28 = vrot.slane %v821_v24, 2 }
 0x1b5   : > { %v818_v30 = vadd.f32 %v817_v16, %v816_v21 }
 0x1b6   : > { %v823_v31 = vadd.f32 %v822_v28, %v821_v24  ;;  %v854_v33 = vrot.slane %v835_v27, 5 }
 0x1b7   : > { %v838_v34 = vadd.f32 %v1618_v60, %v818_v30 }
 0x1b8   : > { %v824_v37 = vrot.slane %v823_v31, 1  ;;  %v856_v38 = vsel %vm855_vm4, %v854_v33, %v853_v35 }
 0x1b9   : > { %v859_v39 = vsel %vm858_vm5, %v857_v36, %v856_v38  ;;  %v863_v42 = vrot.slane %v838_v34, 2 }
 0x1ba   : > { %v825_v40 = vadd.f32 %v824_v37, %v823_v31  ;;  %v862_v44 = vsel %vm861_vm6, %v860_v41, %v859_v39  ;;  %v546_v41 = vld [vmem:[#allocation7] sm:$0xff] }
 0x1bb   : > { %v865_v46 = vsel %vm864_vm7, %v863_v42, %v862_v44 }
 0x1bc   : > { %v839_v43 = vadd.f32 %v1618_v60, %v825_v40  ;;  %v547_v40 = vld [vmem:[#allocation7 + $0x8] sm:$0xff] }
 0x1be   : > { %v866_v45 = vrot.slane %v839_v43, 1 }
 0x1c0   : > { %v868_v47 = vsel %vm867_vm8, %v866_v45, %v865_v46 }
 0x1c1   : > { %870 = vmax.xlane.f32.xlu0 %v868_v47 }
 0x24e   : > { %v871_v48 = vpop.xlane.xlu0 %870 }
 0x24f   : > { %v873_v49 = vrot.slane %v871_v48, 1  ;;  %v874_v50 = vrot.slane %v871_v48, 2  ;;  %v875_v51 = vrot.slane %v871_v48, 3  ;;  %v876_v52 = vrot.slane %v871_v48, 4 }
 0x250   : > { %v877_v53 = vrot.slane %v871_v48, 5  ;;  %v878_v54 = vrot.slane %v871_v48, 6  ;;  %v888_v55 = vsub.f32 %v832_v22, %v871_v48  ;;  %v879_v56 = vrot.slane %v871_v48, 7 }
 0x251   : > { %v889_v57 = vsub.f32 %v833_v1, %v873_v49  ;;  %v890_v58 = vsub.f32 %v834_v14, %v874_v50  ;;  %v891_v59 = vsub.f32 %v835_v27, %v875_v51  ;;  %v892_v60 = vsub.f32 %v836_v25, %v876_v52 }
 0x252   : > { %v896_v61 = vmul.f32 1.442695, %v888_v55  ;;  %v893_v62 = vsub.f32 %v837_v32, %v877_v53  ;;  %v894_v63 = vsub.f32 %v838_v34, %v878_v54  ;;  %v895_v7 = vsub.f32 %v839_v43, %v879_v56  ;;  %v549_v53 = vld [vmem:[#allocation7 + $0x18] sm:$0xff]  ;;  %v548_v54 = vld [vmem:[#allocation7 + $0x10] sm:$0xff] }
 0x253   : > { %v898_v0 = vmul.f32 1.442695, %v889_v57  ;;  %v900_v3 = vmul.f32 1.442695, %v890_v58  ;;  %v902_v4 = vmul.f32 1.442695, %v891_v59 }
 0x254   : > { %1806 = vpow2.f32 %v896_v61  ;;  %v904_v8 = vmul.f32 1.442695, %v892_v60  ;;  %v906_v9 = vmul.f32 1.442695, %v893_v62  ;;  %v908_v10 = vmul.f32 1.442695, %v894_v63 }
 0x255   : > { %1808 = vpow2.f32 %v898_v0  ;;  %v910_v12 = vmul.f32 1.442695, %v895_v7  ;;  %v550_v7 = vld [vmem:[#allocation7 + $0x20] sm:$0xff] }
 0x256   : > { %1810 = vpow2.f32 %v900_v3 }
 0x257   : > { %1812 = vpow2.f32 %v902_v4  ;;  %v551_v4 = vld [vmem:[#allocation7 + $0x28] sm:$0xff] }
 0x258   : > { %1814 = vpow2.f32 %v904_v8 }
 0x259   : > { %1816 = vpow2.f32 %v906_v9 }
 0x25a   : > { %1818 = vpow2.f32 %v908_v10 }
 0x25b   : > { %1820 = vpow2.f32 %v910_v12 }
 0x25e   : > { %v1807_v1 = vpop.eup %1806 }
 0x25f   : > { %v1809_v13 = vpop.eup %1808 }
 0x260   : > { %v1811_v14 = vpop.eup %1810  ;;  %v920_v17 = vrot.slane %v1809_v13, 7 }
 0x261   : > { %v1813_v18 = vpop.eup %1812  ;;  %v922_v19 = vrot.slane %v1811_v14, 6 }
 0x262   : > { %v1815_v20 = vpop.eup %1814  ;;  %v921_v21 = vsel %vm849_vm2, %v920_v17, %v1807_v1  ;;  %v924_v22 = vrot.slane %v1813_v18, 5 }
 0x263   : > { %v1817_v23 = vpop.eup %1816  ;;  %v923_v15 = vsel %vm852_vm3, %v922_v19, %v921_v21  ;;  %v926_v24 = vrot.slane %v1815_v20, 4  ;;  %v553_v19 = vld [vmem:[#allocation7 + $0x38] sm:$0xff] }
 0x264   : > { %v1819_v25 = vpop.eup %1818  ;;  %v925_v26 = vsel %vm855_vm4, %v924_v22, %v923_v15  ;;  %v928_v16 = vrot.slane %v1817_v23, 3 }
 0x265   : > { %v1821_v27 = vpop.eup %1820  ;;  %v927_v28 = vsel %vm858_vm5, %v926_v24, %v925_v26  ;;  %v930_v29 = vrot.slane %v1819_v25, 2 }
 0x266   : > { %v929_v30 = vsel %vm861_vm6, %v928_v16, %v927_v28  ;;  %v932_v31 = vrot.slane %v1821_v27, 1  ;;  %v555_v16 = vld [vmem:[#allocation7 + $0x48] sm:$0xff] }
 0x267   : > { %v931_v32 = vsel %vm864_vm7, %v930_v29, %v929_v30 }
 0x268   : > { %v933_v33 = vsel %vm867_vm8, %v932_v31, %v931_v32  ;;  %v557_v31 = vld [vmem:[#allocation7 + $0x58] sm:$0xff]  ;;  %v556_v32 = vld [vmem:[#allocation7 + $0x50] sm:$0xff] }
 0x269   : > { %935 = vadd.xlane.f32.xlu1 %v933_v33 }
 0x2f6   : > { %v936_v34 = vpop.xlane.xlu1 %935 }
 0x2f7   : > { %1822 = vrcp.f32 %v936_v34 }
 0x301   : > { %v1823_v35 = vpop.eup %1822 }
 0x302   : > { %v954_v36 = vmul.f32 %v1823_v35, %v1807_v1  ;;  %v939_v37 = vrot.slane %v1823_v35, 1  ;;  %v940_v38 = vrot.slane %v1823_v35, 2  ;;  %v941_v39 = vrot.slane %v1823_v35, 3 }
 0x303   : > { %v942_v45 = vrot.slane %v1823_v35, 4  ;;  %v943_v47 = vrot.slane %v1823_v35, 5  ;;  %v944_v48 = vrot.slane %v1823_v35, 6  ;;  %v945_v56 = vrot.slane %v1823_v35, 7 }
 0x304   : > { %v965_v42 = vrot.slane %v954_v36, %v2606_v11  ;;  %v955_v43 = vmul.f32 %v1809_v13, %v939_v37  ;;  %v956_v44 = vmul.f32 %v1811_v14, %v940_v38  ;;  %v957_v46 = vmul.f32 %v1813_v18, %v941_v39  ;;  %v558_v37 = vld [vmem:[#allocation7 + $0x60] sm:$0xff] }
 0x305   : > { %v958_v58 = vmul.f32 %v1815_v20, %v942_v45  ;;  %v959_v61 = vmul.f32 %v1817_v23, %v943_v47  ;;  %v960_v3 = vmul.f32 %v1819_v25, %v944_v48  ;;  %v961_v9 = vmul.f32 %v1821_v27, %v945_v56  ;;  %v552_v20 = vld [vmem:[#allocation7 + $0x30] sm:$0xff]  ;;  %v554_v27 = vld [vmem:[#allocation7 + $0x40] sm:$0xff]  ;;  %v1218_v45 = vld [vmem:[#allocation15] sm:$0xff] }
 0x306   : > { %v995_v49 = vmul.f32 %v965_v42, %v547_v40  ;;  %v994_v50 = vmul.f32 %v965_v42, %v546_v41  ;;  %v969_v51 = vrot.slane %v955_v43, %v2606_v11  ;;  %v1342_v52 = vrot.slane %v955_v43, 7  ;;  %v561_v41 = vld [vmem:[#allocation7 + $0x78] sm:$0xff]  ;;  %v560_v42 = vld [vmem:[#allocation7 + $0x70] sm:$0xff] }
 0x307   : > { %v1344_v55 = vrot.slane %v956_v44, 6  ;;  %v1346_v60 = vrot.slane %v957_v46, 5  ;;  %v973_v0 = vrot.slane %v956_v44, %v2606_v11  ;;  %v1348_v10 = vrot.slane %v958_v58, 4 }
 0x308   : > { %1012 = vadd.xlane.f32.xlu1 %v995_v49  ;;  %1010 = vadd.xlane.f32.xlu0 %v994_v50  ;;  %v1343_v57 = vsel %vm849_vm2, %v1342_v52, %v954_v36  ;;  %v997_v62 = vmul.f32 %v969_v51, %v549_v53  ;;  %v996_v63 = vmul.f32 %v969_v51, %v548_v54  ;;  %v1350_v1 = vrot.slane %v959_v61, 3  ;;  %v559_v36 = vld [vmem:[#allocation7 + $0x68] sm:$0xff]  ;;  %v1044_v50 = vld [vmem:[#allocation13 + $0x8] sm:$0xff] }
 0x309   : > { %v1345_v59 = vsel %vm852_vm3, %v1344_v55, %v1343_v57  ;;  %v977_v12 = vrot.slane %v957_v46, %v2606_v11  ;;  %v999_v13 = vmul.f32 %v973_v0, %v551_v4  ;;  %v998_v14 = vmul.f32 %v973_v0, %v550_v7  ;;  %v1219_v46 = vld [vmem:[#allocation15 + $0x8] sm:$0xff]  ;;  %v1043_v49 = vld [vmem:[#allocation13] sm:$0xff]  ;;  %v1221_v52 = vld [vmem:[#allocation15 + $0x18] sm:$0xff] }
 0x30a   : > { %v1347_v8 = vsel %vm855_vm4, %v1346_v60, %v1345_v59  ;;  %v1352_v17 = vrot.slane %v960_v3, 2  ;;  %v1354_v21 = vrot.slane %v961_v9, 1  ;;  %v981_v26 = vrot.slane %v958_v58, %v2606_v11  ;;  %v1220_v51 = vld [vmem:[#allocation15 + $0x10] sm:$0xff]  ;;  %v529_v55 = vld [vmem:[#allocation3] sm:$0xff] }
 0x30b   : > { %v1349_v18 = vsel %vm858_vm5, %v1348_v10, %v1347_v8  ;;  %v1001_v24 = vmul.f32 %v977_v12, %v553_v19  ;;  %v1000_v25 = vmul.f32 %v977_v12, %v552_v20  ;;  %v985_v30 = vrot.slane %v959_v61, %v2606_v11 }
 0x30c   : > { %1016 = vadd.xlane.f32.xlu1 %v997_v62  ;;  %1014 = vadd.xlane.f32.xlu0 %v996_v63  ;;  %v1351_v22 = vsel %vm861_vm6, %v1350_v1, %v1349_v18  ;;  %v1003_v28 = vmul.f32 %v981_v26, %v555_v16  ;;  %v1002_v29 = vmul.f32 %v981_v26, %v554_v27  ;;  %v2217_v47 = vmov 0.0|0.0  }
 0x30d   : > { %v1353_v23 = vsel %vm864_vm7, %v1352_v17, %v1351_v22  ;;  %v1005_v33 = vmul.f32 %v985_v30, %v557_v31  ;;  %v1004_v34 = vmul.f32 %v985_v30, %v556_v32  ;;  %v989_v35 = vrot.slane %v960_v3, %v2606_v11  ;;  %1661 = vmatprep.subr.bf16.mxu0 %v2217_v47 }
 0x30e   : > { %v1355_v15 = vsel %vm867_vm8, %v1354_v21, %v1353_v23  ;;  %v993_v40 = vrot.slane %v961_v9, %v2606_v11  ;;  %v1662_v48 = vpack.c.bf16 %v1219_v46, %v1218_v45  ;;  %1658 = vmatprep.subr.bf16.mxu1 %v2217_v47  ;;  %v1659_v11 = vpack.c.bf16 %v1044_v50, %v1043_v49  ;;  %v1042_v46 = vld [vmem:[%s462_s1] sm:$0xff]  ;;  %s2222_s1 = smov 96  }
 0x30f   : > { %1357 = vst [vmem:[%s515_s12] sm:$0xff] %v1355_v15  ;;  %v1007_v38 = vmul.f32 %v989_v35, %v559_v36  ;;  %v1006_v39 = vmul.f32 %v989_v35, %v558_v37  ;;  %v2219_v53 = vmov 0.0   ;;  %v1665_v54 = vpack.c.bf16 %v1221_v52, %v1220_v51 }
 0x310   : > { %1020 = vadd.xlane.f32.xlu1 %v999_v13  ;;  %1018 = vadd.xlane.f32.xlu0 %v998_v14  ;;  %v1009_v43 = vmul.f32 %v993_v40, %v561_v41  ;;  %v1008_v44 = vmul.f32 %v993_v40, %v560_v42  ;;  %v1062_v62 = vand.u32 127, %v572_v2 }
 0x311   : > { %1663 = vmatpush3.bf16.msra.mxu0 %v1662_v48  ;;  %1644 = vmatprep.mubr.msk.f32.mxu1 %vm2218_vm9, %v2219_v53 }
 0x312   : > { %1664 = vmatprep.subr.bf16.mxu0 %v2217_v47  ;;  %1655 = vmatprep.mubr.msk.f32.mxu0 %vm2218_vm9, %v2219_v53  ;;  %v1067_v3 = vadd.s32 4294967288, %v1062_v62  ;;  %v1065_v9 = vsub.s32 %v1062_v62, %v2599_v6 }
 0x313   : > { %1660 = vmatpush3.bf16.msra.mxu1 %v1659_v11 }
 0x314   : > { %1024 = vadd.xlane.f32.xlu1 %v1001_v24  ;;  %1022 = vadd.xlane.f32.xlu0 %v1000_v25  ;;  %v1070_v8 = vsub.s32 %v1067_v3, %v2599_v6 }
 0x315   : > { %1666 = vmatpush3.bf16.msra.mxu0 %v1665_v54 }
 0x318   : > { %1028 = vadd.xlane.f32.xlu1 %v1003_v28  ;;  %1026 = vadd.xlane.f32.xlu0 %v1002_v29 }
 0x319   : > { %1656 = vmatmul.mubr.msk.f32.vlgmr.msra.gmra.mrb[0].mxu0 %vm673_vm1, %v2596_v5 }
 0x31c   : > { %1032 = vadd.xlane.f32.xlu1 %v1005_v33  ;;  %1030 = vadd.xlane.f32.xlu0 %v1004_v34 }
 0x320   : > { %1036 = vadd.xlane.f32.xlu1 %v1007_v38  ;;  %1034 = vadd.xlane.f32.xlu0 %v1006_v39 }
 0x324   : > { %1040 = vadd.xlane.f32.xlu1 %v1009_v43  ;;  %1038 = vadd.xlane.f32.xlu0 %v1008_v44 }
 0x335   : > { %1303 = vrot.lane.b32.xlu1 %v529_v55, %s2880_s16 }
 0x395   : > { %v1013_v56 = vpop.xlane.xlu1 %1012  ;;  %v1011_v57 = vpop.xlane.xlu0 %1010 }
 0x396   : > { %v1071_v17 = vrot.slane %v1013_v56, %v1070_v8  ;;  %v1066_v18 = vrot.slane %v1011_v57, %v1065_v9 }
 0x398   : > { %v1073_v26 = vsel %vm1072_vm10, %v1071_v17, %v1066_v18 }
 0x399   : > { %v1017_v58 = vpop.xlane.xlu1 %1016  ;;  %v1015_v59 = vpop.xlane.xlu0 %1014 }
 0x39a   : > { %v1081_v10 = vrot.slane %v1017_v58, %v1070_v8  ;;  %v1077_v12 = vrot.slane %v1015_v59, %v1065_v9 }
 0x39c   : > { %v1082_v22 = vsel %vm1072_vm10, %v1081_v10, %v1077_v12 }
 0x39d   : > { %v1021_v60 = vpop.xlane.xlu1 %1020  ;;  %v1019_v61 = vpop.xlane.xlu0 %1018  ;;  %v1137_v29 = vsel %vm849_vm2, %v1082_v22, %v1073_v26 }
 0x39e   : > { %v1090_v5 = vrot.slane %v1021_v60, %v1070_v8  ;;  %v1086_v1 = vrot.slane %v1019_v61, %v1065_v9 }
 0x3a0   : > { %v1091_v24 = vsel %vm1072_vm10, %v1090_v5, %v1086_v1 }
 0x3a1   : > { %v1025_v63 = vpop.xlane.xlu1 %1024  ;;  %v1023_v0 = vpop.xlane.xlu0 %1022  ;;  %v1138_v31 = vsel %vm852_vm3, %v1091_v24, %v1137_v29 }
 0x3a2   : > { %v1099_v19 = vrot.slane %v1025_v63, %v1070_v8  ;;  %v1095_v20 = vrot.slane %v1023_v0, %v1065_v9 }
 0x3a4   : > { %v1100_v16 = vsel %vm1072_vm10, %v1099_v19, %v1095_v20 }
 0x3a5   : > { %v1029_v4 = vpop.xlane.xlu1 %1028  ;;  %v1027_v7 = vpop.xlane.xlu0 %1026  ;;  %v1139_v33 = vsel %vm855_vm4, %v1100_v16, %v1138_v31 }
 0x3a6   : > { %v1108_v2 = vrot.slane %v1029_v4, %v1070_v8  ;;  %v1104_v21 = vrot.slane %v1027_v7, %v1065_v9 }
 0x3a8   : > { %v1109_v30 = vsel %vm1072_vm10, %v1108_v2, %v1104_v21 }
 0x3a9   : > { %v1033_v13 = vpop.xlane.xlu1 %1032  ;;  %v1031_v14 = vpop.xlane.xlu0 %1030  ;;  %v1140_v37 = vsel %vm858_vm5, %v1109_v30, %v1139_v33 }
 0x3aa   : > { %v1117_v23 = vrot.slane %v1033_v13, %v1070_v8  ;;  %v1113_v15 = vrot.slane %v1031_v14, %v1065_v9 }
 0x3ac   : > { %v1118_v32 = vsel %vm1072_vm10, %v1117_v23, %v1113_v15 }
 0x3ad   : > { %v1037_v6 = vpop.xlane.xlu1 %1036  ;;  %v1035_v25 = vpop.xlane.xlu0 %1034  ;;  %v1141_v40 = vsel %vm861_vm6, %v1118_v32, %v1140_v37 }
 0x3ae   : > { %v1126_v27 = vrot.slane %v1037_v6, %v1070_v8  ;;  %v1122_v28 = vrot.slane %v1035_v25, %v1065_v9 }
 0x3b0   : > { %v1127_v34 = vsel %vm1072_vm10, %v1126_v27, %v1122_v28 }
 0x3b1   : > { %v1041_v35 = vpop.xlane.xlu1 %1040  ;;  %v1039_v36 = vpop.xlane.xlu0 %1038  ;;  %v1142_v42 = vsel %vm864_vm7, %v1127_v34, %v1141_v40 }
 0x3b2   : > { %v1135_v38 = vrot.slane %v1041_v35, %v1070_v8  ;;  %v1131_v39 = vrot.slane %v1039_v36, %v1065_v9 }
 0x3b4   : > { %v1136_v41 = vsel %vm1072_vm10, %v1135_v38, %v1131_v39 }
 0x3b5   : > { %v1143_v43 = vsel %vm867_vm8, %v1136_v41, %v1142_v42  ;;  %v1304_v57 = vpop.permute.xlu1 %1303 }
 0x3b6   : > { %1645 = vmatmul.mubr.msk.f32.vlgmr.msra.gmra.mrb[0].mxu1 %vm1144_vm11, %v1143_v43 }
 0x3ec   : > { %v1290_v44 = vpop.f32.mrb[0].mxu0 }
 0x3ed   : > { %v1657_v45 = vpop.f32.mrb[1].mxu0 }
 0x489   : > { %v1213_v47 = vpop.f32.mrb[0].mxu1 }
 0x48a   : > { %v1217_v48 = vadd.f32 %v1213_v47, %v1042_v46  ;;  %v1646_v49 = vpop.f32.mrb[1].mxu1 }
 0x48c   : > { %v1294_v50 = vadd.f32 %v1290_v44, %v1217_v48 }
 0x48e   : > { %1824 = vtanh.f32 %v1294_v50  ;;  %v1621_v11 = vmul.f32 -1.442695, %v1294_v50 }
 0x490   : > { %1826 = vpow2.f32 %v1621_v11 }
 0x498   : > { %v1825_v51 = vpop.eup %1824 }
 0x499   : > { %1308 = vrot.lane.b32.xlu0 %v1825_v51, %s2221_s15 }
 0x49a   : > { %v1827_v52 = vpop.eup %1826 }
 0x49b   : > { %v1298_v53 = vadd.f32 1.0, %v1827_v52 }
 0x49d   : > { %1828 = vrcp.f32 %v1298_v53 }
 0x4a7   : > { %v1829_v54 = vpop.eup %1828 }
 0x4a8   : > { %v1306_v58 = vmul.f32 %v1829_v54, %v1304_v57 }
 0x50b   : > { %v1309_v55 = vpop.permute.xlu0 %1308 }
 0x50c   : > { %v1311_v56 = vmul.f32 %v1829_v54, %v1309_v55 }
 0x50e   : > { %1313 = vrot.lane.b32.xlu1 %v1311_v56, %s2880_s16 }
 0x580   : > { %v1314_v59 = vpop.permute.xlu1 %1313 }
 0x581   : > { %v1316_v60 = vadd.f32 %v1314_v59, %v1306_v58 }
 0x583   : > { %1830 = vtanh.f32 %v1316_v60 }
 0x58d   : > { %v1831_v61 = vpop.eup %1830 }
 0x58e   : > { %1319 = vrot.lane.b32.xlu1 %v1831_v61, %s2221_s15  ;;  %s2223_s15 = smov [#allocation17]  }
 0x58f   : > { %s2034_s16 = sshll.u32 %s2223_s15, 4  ;;  %s2035_s16 = int_to_ptr.vmem [resolvable:$false] %s2034_s16 }
 0x590   : > { %p2037_p5 = scmp.lt.s32.totalorder %s1393_s14, %s2035_s16 }
 0x592   : > { %1329 = vrot.lane.b32.xlu1 %v1316_v60, %s2222_s1  ;;  %s2036_s1 = scalar_lea.vmem %s2035_s16, 256 }
 0x593   : > { %p2038_p8 = scmp.lt.s32.totalorder %s2036_s1, %s2030_s29 }
 0x595   : > { %p2039_p4 = por %p2038_p8, %p2037_p5 }
 0x597   : > { %p2040_p7 = pnand %p2039_p4, %p2033_p6 }
 0x599   : > { %2043 = shalt.err (!%p2040_p7)
}
 0x59a   : > { %s2044_s13 = scalar_lea.hbm %s2722_s11, 128  ;;  %s2048_s19 = scalar_lea.hbm %s2908_s18, 768 }
 0x59b   : > { %p2045_p3 = scmp.ne.s32.totalorder %s2722_s11, %s2044_s13  ;;  %p2049_p9 = scmp.lt.u32.totalorder %s2722_s11, %s2908_s18 }
 0x59c   : > { %p2050_p12 = scmp.lt.u32.totalorder %s2048_s19, %s2044_s13  ;;  %p2052_p2 = scmp.lt.u32.totalorder %s2044_s13, %s2722_s11 }
 0x59d   : > { %p2046_p10 = pnand %p2045_p3, %p2909_p13 }
 0x59e   : > { %p2051_p1 = por %p2050_p12, %p2049_p9 }
 0x59f   : > { %p2047_p11 = pneg %p2046_p10 }
 0x5a0   : > { %p2053_p0 = por %p2052_p2, %p2051_p1 }
 0x5a2   : > { %p2054_p6 = pnand %p2053_p0, %p2047_p11 }
 0x5a4   : > { %2057 = shalt.err (!%p2054_p6)
}
 0x5a5   : > { %1696 = dma.vmem_to_hbm [thread:$0]  (%p2909_p13), %s1393_s14, 128, %s2722_s11, %s1366_s26  }
 0x5a6   : > { %s2224_s29 = smov [#allocation20]   ;;  %s2910_s12 = smov 32  }
 0x5a7   : > { %s1414_s1 = sshll.u32 %s2224_s29, 4  ;;  %p2911_p8 = scmp.eq.s32.totalorder %s2313_s25, 5  ;;  %s1415_s1 = int_to_ptr.vmem [resolvable:$true] %s1414_s1 }
 0x5a8   : > { %s2058_s13 = scalar_lea.vmem %s1415_s1, 128  ;;  %p2065_p3 = scmp.lt.s32.totalorder %s1415_s1, %s1415_s1 }
 0x5a9   : > { %p2059_p5 = scmp.ne.s32.totalorder %s1415_s1, %s2058_s13  ;;  %p2066_p10 = scmp.lt.s32.totalorder %s2058_s13, %s2058_s13 }
 0x5ab   : > { %p2060_p4 = pnand %p2059_p5, %p2911_p8  ;;  %p2067_p11 = por %p2066_p10, %p2065_p3 }
 0x5ad   : > { %p2061_p7 = pneg %p2060_p4 }
 0x5af   : > { %p2068_p9 = pnand %p2067_p11, %p2061_p7 }
 0x600   : > { %v1320_v62 = vpop.permute.xlu1 %1319 }
 0x601   : > { %v1322_v63 = vmul.f32 %v1829_v54, %v1320_v62 }
 0x603   : > { %1324 = vrot.lane.b32.xlu0 %v1322_v63, %s2910_s12 }
 0x604   : > { %v1330_v0 = vpop.permute.xlu1 %1329 }
 0x605   : > { %1332 = vst.msk [vmem:[#allocation3] sm:$0xff] %vm673_vm1, %v1330_v0  ;;  %1359 = vst.msk [vmem:[#allocation20] sm:$0xff] %vm673_vm1, %v1330_v0 }
 0x606   : > { %2071 = shalt.err (!%p2068_p9)
}
 0x607   : > { %s2912_s14 = sld [smem:[#allocation36_spill]]  ;;  %p2913_p1 = pmov %p2911_p8 }
 0x60d   : > { %s2072_s30 = scalar_lea.hbm %s2912_s14, 128 }
 0x60e   : > { %p2073_p12 = scmp.ne.s32.totalorder %s2912_s14, %s2072_s30  ;;  %p2078_p6 = scmp.lt.u32.totalorder %s2072_s30, %s2912_s14 }
 0x610   : > { %p2074_p2 = pnand %p2073_p12, %p2913_p1 }
 0x612   : > { %p2075_p0 = pneg %p2074_p2 }
 0x614   : > { %p2080_p5 = pnand %p2078_p6, %p2075_p0 }
 0x616   : > { %2083 = shalt.err (!%p2080_p5)
}
 0x617   : > { %p2914_p8 = pmov %p2913_p1  ;;  %s2915_s26 = scalar_lea.vmem [#allocation16], %s2575_s28 }
 0x618   : > { %s1379_s11 = sshll.u32 %s2915_s26, 4  ;;  %s2225_s19 = smov [#allocation19]   ;;  %s2775_s11 = int_to_ptr.vmem [resolvable:$true] %s1379_s11 }
 0x619   : > { %1700 = dma.vmem_to_hbm [thread:$0]  (%p2914_p8), %s1415_s1, 128, %s2912_s14, [#allocation21]  }
 0x61a   : > { %s1403_s15 = sshll.u32 %s2225_s19, 4  ;;  %s2916_s29 = sld [smem:[#allocation33_spill]]  ;;  %s2777_s15 = int_to_ptr.vmem [resolvable:$true] %s1403_s15 }
 0x61b   : > { %s2917_s1 = smov %s2915_s26  ;;  %s2918_s12 = sand.u32 1, %s2196_s22  }
 0x61c   : > { %s1361_s13 = scalar_lea.sflag [#allocation6], %s2918_s12  ;;  %s2084_s26 = scalar_lea.vmem %s2775_s11, 128 }
 0x61d   : > { %p2085_p4 = scmp.ne.s32.totalorder %s2775_s11, %s2084_s26 }
 0x61f   : > { %p2086_p7 = pnand %p2085_p4, %p2909_p13 }
 0x620   : > { %s2773_s0 = scalar_lea.hbm %s2916_s29, %s1624_s17  ;;  %s2226_s17 = smov [#allocation16]  }
 0x621   : > { %p2087_p3 = pneg %p2086_p7  ;;  %s2088_s19 = sshll.u32 %s2226_s17, 4  ;;  %s2089_s19 = int_to_ptr.vmem [resolvable:$false] %s2088_s19 }
 0x622   : > { %s2090_s16 = scalar_lea.vmem %s2089_s19, 256  ;;  %p2091_p10 = scmp.lt.s32.totalorder %s2775_s11, %s2089_s19 }
 0x623   : > { %p2092_p11 = scmp.lt.s32.totalorder %s2090_s16, %s2084_s26 }
 0x625   : > { %p2093_p9 = por %p2092_p11, %p2091_p10 }
 0x627   : > { %p2094_p12 = pnand %p2093_p9, %p2087_p3 }
 0x675   : > { %v1325_v3 = vpop.permute.xlu0 %1324 }
 0x676   : > { %1327 = vst.msk [vmem:[#allocation2] sm:$0xff] %vm673_vm1, %v1325_v3  ;;  %1333 = vst.msk [vmem:[%s2917_s1] sm:$0xff] %vm673_vm1, %v1325_v3 }
 0x677   : > { %1358 = vst.msk [vmem:[#allocation19] sm:$0xff] %vm673_vm1, %v1325_v3 }
 0x678   : > { %2097 = shalt.err (!%p2094_p12)
}
 0x679   : > { %s2098_s28 = scalar_lea.hbm %s2773_s0, 128  ;;  %s2102_s12 = scalar_lea.hbm %s2916_s29, 768 }
 0x67a   : > { %p2099_p1 = scmp.ne.s32.totalorder %s2773_s0, %s2098_s28  ;;  %p2103_p6 = scmp.lt.u32.totalorder %s2773_s0, %s2916_s29 }
 0x67b   : > { %p2104_p5 = scmp.lt.u32.totalorder %s2102_s12, %s2098_s28  ;;  %p2106_p4 = scmp.lt.u32.totalorder %s2098_s28, %s2773_s0 }
 0x67c   : > { %p2100_p2 = pnand %p2099_p1, %p2909_p13 }
 0x67d   : > { %p2105_p8 = por %p2104_p5, %p2103_p6 }
 0x67e   : > { %p2101_p0 = pneg %p2100_p2 }
 0x67f   : > { %p2107_p7 = por %p2106_p4, %p2105_p8 }
 0x681   : > { %p2108_p3 = pnand %p2107_p7, %p2101_p0 }
 0x683   : > { %2111 = shalt.err (!%p2108_p3)
}
 0x684   : > { %1695 = dma.vmem_to_hbm [thread:$0]  (%p2909_p13), %s2775_s11, 128, %s2773_s0, %s1361_s13  }
 0x685   : > { %s2112_s26 = scalar_lea.vmem %s2777_s15, 128  ;;  %p2919_p11 = scmp.eq.s32.totalorder %s2313_s25, 5 }
 0x686   : > { %p2113_p10 = scmp.ne.s32.totalorder %s2777_s15, %s2112_s26  ;;  %p2119_p1 = scmp.lt.s32.totalorder %s2777_s15, %s2777_s15 }
 0x687   : > { %p2120_p2 = scmp.lt.s32.totalorder %s2112_s26, %s2112_s26 }
 0x688   : > { %p2114_p9 = pnand %p2113_p10, %p2919_p11 }
 0x689   : > { %p2121_p6 = por %p2120_p2, %p2119_p1 }
 0x68a   : > { %p2115_p12 = pneg %p2114_p9 }
 0x68c   : > { %p2122_p0 = pnand %p2121_p6, %p2115_p12 }
 0x68e   : > { %2125 = shalt.err (!%p2122_p0)
}
 0x68f   : > { %s2920_s28 = sld [smem:[#allocation35_spill]]  ;;  %p2921_p5 = pmov %p2919_p11 }
 0x695   : > { %s2126_s30 = scalar_lea.hbm %s2920_s28, 128 }
 0x696   : > { %p2127_p13 = scmp.ne.s32.totalorder %s2920_s28, %s2126_s30  ;;  %p2132_p7 = scmp.lt.u32.totalorder %s2126_s30, %s2920_s28 }
 0x698   : > { %p2128_p8 = pnand %p2127_p13, %p2921_p5 }
 0x69a   : > { %p2129_p4 = pneg %p2128_p8 }
 0x69c   : > { %p2134_p3 = pnand %p2132_p7, %p2129_p4 }
 0x69e   : > { %2137 = shalt.err (!%p2134_p3)
}
 0x69f   : > { %p2922_p10 = pmov %p2921_p5  ;;  %p2923_p11 = pmov %p2921_p5 }
 0x6a1   : > { %1698 = dma.vmem_to_hbm [thread:$0]  (%p2922_p10), %s2777_s15, 128, %s2920_s28, [#allocation18]  }
 0x6a2   : > { %2175 = dma.done.wait (%p2923_p11), [#allocation18], 128   ;;  %p2924_p9 = pmov %p2921_p5 }
 0x6a3   : > { %p2925_p12 = pmov %p2921_p5 }
 0x6a4   : > { %2177 = vsyncadd (%p2924_p9), [#allocation18], 4294967168 }
 0x6a5   : > { %2179 = dma.done.wait (%p2925_p12), [#allocation21], 128   ;;  %p2926_p1 = pmov %p2921_p5 }
 0x6a7   : > { %2181 = vsyncadd (%p2926_p1), [#allocation21], 4294967168 }
 0x6a8 PF: > { %p1754_p2 = scmp.ge.s32.totalorder %s2204_s24, 2  ;;  %s1434_s19 = sand.u32 1, %s2192_s21  }
 0x6a9   : > { %p2927_p6 = scmp.ne.s32.totalorder %s2896_s20, 0  ;;  %s1435_s15 = scalar_lea.sflag [#allocation6], %s1434_s19 }
 0x6ab   : > { %p1731_p0 = pnand %p1754_p2, %p2927_p6 }
 0x6ad   : > { %2183 = dma.done.wait (!%p1731_p0), %s1435_s15, 128  }
 0x6ae   : > { %2185 = vsyncadd (!%p1731_p0), %s1435_s15, 4294967168  ;;  %s2928_s26 = sadd.s32 4294967294, %s2204_s24  }
 0x6af   : > { %s1443_s16 = sand.u32 1, %s2928_s26  }
 0x6b0   : > { %s1444_s9 = scalar_lea.sflag [#allocation18], %s1443_s16 }
 0x6b1   : > { %2187 = dma.done.wait (!%p1731_p0), %s1444_s9, 128  }
 0x6b2   : > { %2189 = vsyncadd (!%p1731_p0), %s1444_s9, 4294967168  ;;  %p33_p13 = scmp.ge.s32.totalorder %s2483_s27, 8   ;;  %s2929_s21 = smov %s2196_s22 }
 0x6b3   : > { %s2930_s22 = smov %s2200_s23  ;;  %s2931_s23 = smov %s2494_s10 }
 0x6b4   : > { %s2932_s24 = smov %s2483_s27  ;;  %35 = sbr.rel (!%p33_p13) target bundleno = 18 (0x12), region = 163 }
 0x6bb   :  { %1449 = vsyncpa [#allocation5], 1 }
 0x6bc   :  { %1451 = vsyncpa [#allocation5 + $0x1], 1 }
 0x6bd   :  { %1452 = vsyncpa [#allocation8], 1 }
 0x6be   :  { %1453 = vsyncpa [#allocation11], 1 }
 0x6bf   :  { %1455 = vsyncpa [#allocation11 + $0x1], 1 }
 0x6c0   :  { %1456 = vsyncpa [#allocation14], 1 }
 0x6c1   :  { %1457 = vsyncpa [#allocation6], 1 }
 0x6c2   :  { %1459 = vsyncpa [#allocation6 + $0x1], 1 }
 0x6c3   :  { %1460 = vsyncpa [#allocation18], 1 }
 0x6c4   :  { %1462 = vsyncpa [#allocation18 + $0x1], 1 }
 0x6c5   :  { %1463 = vsyncpa [#allocation21], 1 }

</bundles_post_ra>
